<compile_context>
chip_gen: v5e
topology: v5e:2x2
jax: 0.10.0
libtpu: 0.0.40
codegen_flags: <defaults>
</compile_context>

<pallas_src>
import math
import jax
import jax.numpy as jnp
from jax import lax
from jax.experimental import pallas as pl
from jax.experimental.pallas import tpu as pltpu


LN_EPS = 1e-5                  # HF roberta layer_norm_eps (python float -> literal)
NEG_INF = -1e9                 # additive attention-mask bias
INV_SQRT2 = 0.7071067811865475


def _layer_norm(h, g, b):
    mu = jnp.mean(h, axis=-1, keepdims=True)
    var = jnp.mean((h - mu) * (h - mu), axis=-1, keepdims=True)
    return (h - mu) * lax.rsqrt(var + LN_EPS) * g + b


def _gelu_exact(x):
    return 0.5 * x * (1.0 + lax.erf(x * INV_SQRT2))


class Config:
    vocab_size = 100
    hidden = 32
    num_heads = 4
    head_dim = 8
    intermediate = 64
    num_layers = 2
    max_pos = 16          # roberta-base: 514 = 512 + pad offset, scaled down
    type_vocab = 1
    pad_idx = 1
    num_labels = 2


# --------------------- single fused kernel (embed-LN + L layers + head) -------

def _make_fused_kernel(cfg, B, S):
    H, I = cfg.hidden, cfg.intermediate
    NH, D = cfg.num_heads, cfg.head_dim
    L = cfg.num_layers

    def kernel(emb_ref, mask_ref, embln_ref, w_in_ref, w_out_ref, vec_ref,
               hw_ref, hvec_ref, o_ref, x_scr, ctx_scr):
        l = pl.program_id(0)

        # ---- first grid step: embedding LayerNorm seeds the resident activation
        @pl.when(l == 0)
        def _():
            x_scr[...] = _layer_norm(emb_ref[...],
                                     embln_ref[:, :H], embln_ref[:, H:])

        x = x_scr[...]                                   # (B*S, H) f32
        x_bf = x.astype(jnp.bfloat16)

        # packed per-layer bias / LN vectors: static lane slices of one stream
        o0 = 0
        bqkv = vec_ref[:, o0:o0 + 3 * H]; o0 += 3 * H
        bo   = vec_ref[:, o0:o0 + H];     o0 += H
        ln1g = vec_ref[:, o0:o0 + H];     o0 += H
        ln1b = vec_ref[:, o0:o0 + H];     o0 += H
        bi   = vec_ref[:, o0:o0 + I];     o0 += I
        bout = vec_ref[:, o0:o0 + H];     o0 += H
        ln2g = vec_ref[:, o0:o0 + H];     o0 += H
        ln2b = vec_ref[:, o0:o0 + H]

        # fused QKV projection over ALL B*S rows in one MXU pass
        # (1/sqrt(D) pre-folded into the Q columns of the weight and bias)
        qkv = jnp.dot(x_bf, w_in_ref[:, :3 * H],
                      preferred_element_type=jnp.float32) + bqkv     # (B*S, 3H)

        # additive attention bias from the raw {0,1} mask
        bias = (1.0 - mask_ref[...]) * NEG_INF                        # (B, S)

        # multi-head attention: only the (S,S) score/softmax blocks loop per
        # (batch, head); each head writes straight into ctx scratch (no concat)
        for b in range(B):
            r0, r1 = b * S, (b + 1) * S
            mb = bias[b:b + 1, :]                                     # (1, S)
            for h in range(NH):
                c0, c1 = h * D, (h + 1) * D
                q = qkv[r0:r1, c0:c1]                                 # scaled Q
                k = qkv[r0:r1, H + c0:H + c1]
                v = qkv[r0:r1, 2 * H + c0:2 * H + c1].astype(jnp.bfloat16)
                s = lax.dot_general(q, k, (((1,), (1,)), ((), ())),
                                    preferred_element_type=jnp.float32)  # (S,S)
                s = s + mb
                s = s - jnp.max(s, axis=-1, keepdims=True)
                p = jnp.exp(s)
                p = p * pl.reciprocal(jnp.sum(p, axis=-1, keepdims=True),
                                      approx=True)
                ctx_scr[r0:r1, c0:c1] = jnp.dot(
                    p.astype(jnp.bfloat16), v, preferred_element_type=jnp.float32)

        # attention output projection + residual + LayerNorm
        attn = jnp.dot(ctx_scr[...].astype(jnp.bfloat16),
                       w_in_ref[:, 3 * H:4 * H],
                       preferred_element_type=jnp.float32) + bo
        h1 = _layer_norm(attn + x, ln1g, ln1b)

        # feed-forward (exact-erf GELU) + residual + LayerNorm
        ff = jnp.dot(h1.astype(jnp.bfloat16), w_in_ref[:, 4 * H:],
                     preferred_element_type=jnp.float32) + bi
        ff = _gelu_exact(ff)
        ffo = jnp.dot(ff.astype(jnp.bfloat16), w_out_ref[...],
                      preferred_element_type=jnp.float32) + bout
        x_new = _layer_norm(ffo + h1, ln2g, ln2b)
        x_scr[...] = x_new

        # ---- last grid step: fused CLS head (Linear -> ReLU -> Linear -> Softmax)
        @pl.when(l == L - 1)
        def _():
            z = jnp.concatenate([x_new[b * S:b * S + 1, :] for b in range(B)],
                                axis=0)                               # (B, H) CLS
            hcls = jnp.dot(z.astype(jnp.bfloat16), hw_ref[:, :H],
                           preferred_element_type=jnp.float32) + hvec_ref[:, :H]
            hcls = jnp.maximum(hcls, 0.0)     # ReLU; Dropout(0.5) = identity (eval)
            logits = jnp.dot(hcls.astype(jnp.bfloat16), hw_ref[:, H:],
                             preferred_element_type=jnp.float32) + hvec_ref[:, H:]
            logits = logits - jnp.max(logits, axis=-1, keepdims=True)
            e = jnp.exp(logits)
            o_ref[...] = e / jnp.sum(e, axis=-1, keepdims=True)       # exact softmax

    return kernel


def roberta_fused(emb_sum, mask_f, pk, cfg, B, S):
    H, I, L, C = cfg.hidden, cfg.intermediate, cfg.num_layers, cfg.num_labels
    M = B * S
    WIN = 4 * H + I          # [Wqkv | Wo | Wi]
    VP = 9 * H + I           # packed bias/LN vector width per layer

    kernel = _make_fused_kernel(cfg, B, S)

    in_specs = [
        pl.BlockSpec((M, H), lambda l: (0, 0)),             # summed embeddings
        pl.BlockSpec((B, S), lambda l: (0, 0)),             # attention mask {0,1}
        pl.BlockSpec((1, 2 * H), lambda l: (0, 0)),         # embed-LN gamma|beta
        pl.BlockSpec((None, H, WIN), lambda l: (l, 0, 0)),  # per-layer [Wqkv|Wo|Wi]
        pl.BlockSpec((None, I, H), lambda l: (l, 0, 0)),    # per-layer Wout
        pl.BlockSpec((None, 1, VP), lambda l: (l, 0, 0)),   # per-layer packed vecs
        pl.BlockSpec((H, H + C), lambda l: (0, 0)),         # [head W1 | head W2]
        pl.BlockSpec((1, H + C), lambda l: (0, 0)),         # [head b1 | head b2]
    ]
    return pl.pallas_call(
        kernel,
        out_shape=jax.ShapeDtypeStruct((B, C), jnp.float32),
        grid=(L,),
        in_specs=in_specs,
        out_specs=pl.BlockSpec((B, C), lambda l: (0, 0)),
        scratch_shapes=[pltpu.VMEM((M, H), jnp.float32),    # resident activation
                        pltpu.VMEM((M, H), jnp.float32)],   # attention context
        compiler_params=pltpu.CompilerParams(
            dimension_semantics=("arbitrary",),             # layers are sequential
            vmem_limit_bytes=32 * 1024 * 1024,
        ),
    )(emb_sum, mask_f, pk["emb_ln"], pk["w_in"], pk["w_out"], pk["vecs"],
      pk["head_w"], pk["head_vec"])


# ------------------------------ params ----------------------------------------

def init_params(key, cfg):
    H, I = cfg.hidden, cfg.intermediate

    def nrm(k, shape):
        return 0.02 * jax.random.normal(k, shape, dtype=jnp.float32)

    keys = iter(jax.random.split(key, 128))
    p = {
        "word_emb": nrm(next(keys), (cfg.vocab_size, H)),
        "pos_emb": nrm(next(keys), (cfg.max_pos, H)),
        "type_emb": nrm(next(keys), (cfg.type_vocab, H)),
        "emb_ln_g": jnp.ones((1, H), jnp.float32),
        "emb_ln_b": jnp.zeros((1, H), jnp.float32),
        "layers": [],
        "head_w1": nrm(next(keys), (H, H)),
        "head_b1": jnp.zeros((1, H), jnp.float32),
        "head_w2": nrm(next(keys), (H, cfg.num_labels)),
        "head_b2": jnp.zeros((1, cfg.num_labels), jnp.float32),
    }
    for _ in range(cfg.num_layers):
        p["layers"].append({
            "wq": nrm(next(keys), (H, H)), "bq": jnp.zeros((1, H), jnp.float32),
            "wk": nrm(next(keys), (H, H)), "bk": jnp.zeros((1, H), jnp.float32),
            "wv": nrm(next(keys), (H, H)), "bv": jnp.zeros((1, H), jnp.float32),
            "wo": nrm(next(keys), (H, H)), "bo": jnp.zeros((1, H), jnp.float32),
            "ln1_g": jnp.ones((1, H), jnp.float32),
            "ln1_b": jnp.zeros((1, H), jnp.float32),
            "wi": nrm(next(keys), (H, I)), "bi": jnp.zeros((1, I), jnp.float32),
            "wout": nrm(next(keys), (I, H)),
            "bout": jnp.zeros((1, H), jnp.float32),
            "ln2_g": jnp.ones((1, H), jnp.float32),
            "ln2_b": jnp.zeros((1, H), jnp.float32),
        })
    return p


def pack_params(p, cfg):
    """One-time weight transform (not per-forward): fold 1/sqrt(D) into Q,
    fuse QKV/Wo/Wi, stack layers on a leading L axis, pack small vectors into
    one lane-dense stream, cast matmul weights to bf16 (f32 MXU accumulate)."""
    scale = 1.0 / math.sqrt(cfg.head_dim)
    w_in, w_out, vecs = [], [], []
    for lp in p["layers"]:
        wqkv = jnp.concatenate([lp["wq"] * scale, lp["wk"], lp["wv"]], axis=1)
        bqkv = jnp.concatenate([lp["bq"] * scale, lp["bk"], lp["bv"]], axis=1)
        w_in.append(jnp.concatenate([wqkv, lp["wo"], lp["wi"]], axis=1))
        w_out.append(lp["wout"])
        vecs.append(jnp.concatenate(
            [bqkv, lp["bo"], lp["ln1_g"], lp["ln1_b"],
             lp["bi"], lp["bout"], lp["ln2_g"], lp["ln2_b"]], axis=1))
    return {
        "word_emb": p["word_emb"],
        "pos_emb": p["pos_emb"],
        "type_emb": p["type_emb"],
        "emb_ln": jnp.concatenate([p["emb_ln_g"], p["emb_ln_b"]], axis=1),
        "w_in": jnp.stack(w_in).astype(jnp.bfloat16),      # (L, H, 4H+I)
        "w_out": jnp.stack(w_out).astype(jnp.bfloat16),    # (L, I, H)
        "vecs": jnp.stack(vecs),                           # (L, 1, 9H+I) f32
        "head_w": jnp.concatenate([p["head_w1"], p["head_w2"]],
                                  axis=1).astype(jnp.bfloat16),   # (H, H+C)
        "head_vec": jnp.concatenate([p["head_b1"], p["head_b2"]], axis=1),
    }


# ------------------------------ forward (glue) ---------------------------------

def roberta_forward(pk, input_ids, attention_mask, token_type_ids, cfg):
    B, S = input_ids.shape

    # RoBERTa position ids: cumsum over non-pad tokens, offset by padding_idx
    not_pad = (input_ids != cfg.pad_idx).astype(jnp.int32)
    position_ids = jnp.cumsum(not_pad, axis=1) * not_pad + cfg.pad_idx

    # TODO(synk): row-gathers stay in XLA (in-kernel would need scalar-prefetch
    # + pl.Element gather); summed here so only ONE (B*S, H) array crosses HBM.
    we = jnp.take(pk["word_emb"], input_ids.reshape(-1), axis=0)
    pe = jnp.take(pk["pos_emb"], position_ids.reshape(-1), axis=0)
    te = jnp.take(pk["type_emb"], token_type_ids.reshape(-1), axis=0)
    emb_sum = we + pe + te                                  # (B*S, H) f32

    mask_f = attention_mask.astype(jnp.float32)             # (B, S) {0,1}
    return roberta_fused(emb_sum, mask_f, pk, cfg, B, S)


# ---------------------------------- main ---------------------------------------

if __name__ == "__main__":
    cfg = Config()
    key = jax.random.PRNGKey(0)
    k_param, k_ids = jax.random.split(key)

    params = init_params(k_param, cfg)
    packed = pack_params(params, cfg)

    B, S = 2, 8
    input_ids = jax.random.randint(k_ids, (B, S), 3, cfg.vocab_size,
                                   dtype=jnp.int32)
    input_ids = input_ids.at[:, 0].set(0)          # <s> token, like the tokenizer
    attention_mask = jnp.ones((B, S), dtype=jnp.int32)
    token_type_ids = jnp.zeros((B, S), dtype=jnp.int32)

    @jax.jit
    def fwd(pk, ids, am, tt):
        return roberta_forward(pk, ids, am, tt, cfg)

    probs = jax.block_until_ready(fwd(packed, input_ids, attention_mask,
                                      token_type_ids))

    assert probs.shape == (B, cfg.num_labels)
    assert bool(jnp.all(jnp.isfinite(probs)))
    assert bool(jnp.allclose(jnp.sum(probs, axis=1), 1.0, atol=1e-5))
    print("KERNEL_OK")
</pallas_src>

<mosaic_0001>
module attributes {stable_mosaic.version = 11 : i64} {
  func.func @kernel(%arg0: i32, %arg1: memref<16x32xf32, #tpu.memory_space<vmem>>, %arg2: memref<2x8xf32, #tpu.memory_space<vmem>>, %arg3: memref<1x64xf32, #tpu.memory_space<vmem>>, %arg4: memref<1x32x192xbf16, #tpu.memory_space<vmem>>, %arg5: memref<1x64x32xbf16, #tpu.memory_space<vmem>>, %arg6: memref<1x1x352xf32, #tpu.memory_space<vmem>>, %arg7: memref<32x34xbf16, #tpu.memory_space<vmem>>, %arg8: memref<1x34xf32, #tpu.memory_space<vmem>>, %arg9: memref<2x2xf32, #tpu.memory_space<vmem>>, %arg10: memref<16x32xf32, #tpu.memory_space<vmem>>, %arg11: memref<16x32xf32, #tpu.memory_space<vmem>>) attributes {dimension_semantics = [#tpu.dimension_semantics<arbitrary>], iteration_bounds = array<i64: 2>, scalar_prefetch = 0 : i64, scratch_operands = 2 : i64, tpu.core_type = #tpu.core_type<tc>, window_params = [{pipeline_mode = #tpu.pipeline_mode<synchronous>, transform_indices = @transform_0, window_bounds = array<i64: 16, 32>}, {pipeline_mode = #tpu.pipeline_mode<synchronous>, transform_indices = @transform_1, window_bounds = array<i64: 2, 8>}, {pipeline_mode = #tpu.pipeline_mode<synchronous>, transform_indices = @transform_2, window_bounds = array<i64: 1, 64>}, {transform_indices = @transform_3, window_bounds = array<i64: 1, 32, 192>}, {transform_indices = @transform_4, window_bounds = array<i64: 1, 64, 32>}, {transform_indices = @transform_5, window_bounds = array<i64: 1, 1, 352>}, {pipeline_mode = #tpu.pipeline_mode<synchronous>, transform_indices = @transform_6, window_bounds = array<i64: 32, 34>}, {pipeline_mode = #tpu.pipeline_mode<synchronous>, transform_indices = @transform_7, window_bounds = array<i64: 1, 34>}, {pipeline_mode = #tpu.pipeline_mode<synchronous>, transform_indices = @transform_8, window_bounds = array<i64: 2, 2>}]} {
    %c0_i32 = arith.constant 0 : i32
    %0 = arith.cmpi eq, %arg0, %c0_i32 : i32
    %1 = arith.extui %0 : i1 to i32
    %c0_i32_0 = arith.constant 0 : i32
    %2 = arith.cmpi ne, %1, %c0_i32_0 : i32
    scf.if %2 {
      %c0_101 = arith.constant 0 : index
      %c0_102 = arith.constant 0 : index
      %274 = vector.load %arg1[%c0_101, %c0_102] : memref<16x32xf32, #tpu.memory_space<vmem>>, vector<16x32xf32>
      %c0_103 = arith.constant 0 : index
      %c0_104 = arith.constant 0 : index
      %275 = vector.load %arg3[%c0_103, %c0_104] : memref<1x64xf32, #tpu.memory_space<vmem>>, vector<1x32xf32>
      %c0_105 = arith.constant 0 : index
      %c32 = arith.constant 32 : index
      %276 = vector.load %arg3[%c0_105, %c32] : memref<1x64xf32, #tpu.memory_space<vmem>>, vector<1x32xf32>
      %cst_106 = arith.constant dense<0.000000e+00> : vector<16xf32>
      %277 = vector.multi_reduction <add>, %274, %cst_106 [1] : vector<16x32xf32> to vector<16xf32>
      %278 = vector.shape_cast %277 : vector<16xf32> to vector<16x1xf32>
      %cst_107 = arith.constant 3.200000e+01 : f32
      %279 = vector.broadcast %cst_107 : f32 to vector<16x1xf32>
      %280 = arith.divf %278, %279 : vector<16x1xf32>
      %281 = vector.broadcast %280 : vector<16x1xf32> to vector<16x32xf32>
      %282 = arith.subf %274, %281 : vector<16x32xf32>
      %283 = vector.broadcast %280 : vector<16x1xf32> to vector<16x32xf32>
      %284 = arith.subf %274, %283 : vector<16x32xf32>
      %285 = arith.mulf %282, %284 : vector<16x32xf32>
      %cst_108 = arith.constant dense<0.000000e+00> : vector<16xf32>
      %286 = vector.multi_reduction <add>, %285, %cst_108 [1] : vector<16x32xf32> to vector<16xf32>
      %287 = vector.shape_cast %286 : vector<16xf32> to vector<16x1xf32>
      %cst_109 = arith.constant 3.200000e+01 : f32
      %288 = vector.broadcast %cst_109 : f32 to vector<16x1xf32>
      %289 = arith.divf %287, %288 : vector<16x1xf32>
      %290 = vector.broadcast %280 : vector<16x1xf32> to vector<16x32xf32>
      %291 = arith.subf %274, %290 : vector<16x32xf32>
      %cst_110 = arith.constant 9.99999974E-6 : f32
      %292 = vector.broadcast %cst_110 : f32 to vector<16x1xf32>
      %293 = arith.addf %289, %292 : vector<16x1xf32>
      %294 = math.rsqrt %293 : vector<16x1xf32>
      %295 = vector.broadcast %294 : vector<16x1xf32> to vector<16x32xf32>
      %296 = arith.mulf %291, %295 : vector<16x32xf32>
      %297 = vector.broadcast %275 : vector<1x32xf32> to vector<16x32xf32>
      %298 = arith.mulf %296, %297 : vector<16x32xf32>
      %299 = vector.broadcast %276 : vector<1x32xf32> to vector<16x32xf32>
      %300 = arith.addf %298, %299 : vector<16x32xf32>
      %c0_111 = arith.constant 0 : index
      %c0_112 = arith.constant 0 : index
      %301 = vector.load %arg10[%c0_111, %c0_112] : memref<16x32xf32, #tpu.memory_space<vmem>>, vector<16x32xf32>
      tpu.vector_store %arg10[%c0_111, %c0_112], %300 {strides = array<i32>} : memref<16x32xf32, #tpu.memory_space<vmem>>, vector<16x32xf32>,
    } else {
    }
    %c0 = arith.constant 0 : index
    %c0_1 = arith.constant 0 : index
    %3 = vector.load %arg10[%c0, %c0_1] : memref<16x32xf32, #tpu.memory_space<vmem>>, vector<16x32xf32>
    %4 = arith.truncf %3 : vector<16x32xf32> to vector<16x32xbf16>
    %c0_2 = arith.constant 0 : index
    %c0_3 = arith.constant 0 : index
    %c0_4 = arith.constant 0 : index
    %5 = vector.load %arg6[%c0_2, %c0_3, %c0_4] : memref<1x1x352xf32, #tpu.memory_space<vmem>>, vector<1x1x96xf32>
    %6 = vector.shape_cast %5 : vector<1x1x96xf32> to vector<1x96xf32>
    %c0_5 = arith.constant 0 : index
    %c0_6 = arith.constant 0 : index
    %c96 = arith.constant 96 : index
    %7 = vector.load %arg6[%c0_5, %c0_6, %c96] : memref<1x1x352xf32, #tpu.memory_space<vmem>>, vector<1x1x32xf32>
    %8 = vector.shape_cast %7 : vector<1x1x32xf32> to vector<1x32xf32>
    %c0_7 = arith.constant 0 : index
    %c0_8 = arith.constant 0 : index
    %c128 = arith.constant 128 : index
    %9 = vector.load %arg6[%c0_7, %c0_8, %c128] : memref<1x1x352xf32, #tpu.memory_space<vmem>>, vector<1x1x32xf32>
    %10 = vector.shape_cast %9 : vector<1x1x32xf32> to vector<1x32xf32>
    %c0_9 = arith.constant 0 : index
    %c0_10 = arith.constant 0 : index
    %c160 = arith.constant 160 : index
    %11 = vector.load %arg6[%c0_9, %c0_10, %c160] : memref<1x1x352xf32, #tpu.memory_space<vmem>>, vector<1x1x32xf32>
    %12 = vector.shape_cast %11 : vector<1x1x32xf32> to vector<1x32xf32>
    %c0_11 = arith.constant 0 : index
    %c0_12 = arith.constant 0 : index
    %c192 = arith.constant 192 : index
    %13 = vector.load %arg6[%c0_11, %c0_12, %c192] : memref<1x1x352xf32, #tpu.memory_space<vmem>>, vector<1x1x64xf32>
    %14 = vector.shape_cast %13 : vector<1x1x64xf32> to vector<1x64xf32>
    %c0_13 = arith.constant 0 : index
    %c0_14 = arith.constant 0 : index
    %c256 = arith.constant 256 : index
    %15 = vector.load %arg6[%c0_13, %c0_14, %c256] : memref<1x1x352xf32, #tpu.memory_space<vmem>>, vector<1x1x32xf32>
    %16 = vector.shape_cast %15 : vector<1x1x32xf32> to vector<1x32xf32>
    %c0_15 = arith.constant 0 : index
    %c0_16 = arith.constant 0 : index
    %c288 = arith.constant 288 : index
    %17 = vector.load %arg6[%c0_15, %c0_16, %c288] : memref<1x1x352xf32, #tpu.memory_space<vmem>>, vector<1x1x32xf32>
    %18 = vector.shape_cast %17 : vector<1x1x32xf32> to vector<1x32xf32>
    %c0_17 = arith.constant 0 : index
    %c0_18 = arith.constant 0 : index
    %c320 = arith.constant 320 : index
    %19 = vector.load %arg6[%c0_17, %c0_18, %c320] : memref<1x1x352xf32, #tpu.memory_space<vmem>>, vector<1x1x32xf32>
    %20 = vector.shape_cast %19 : vector<1x1x32xf32> to vector<1x32xf32>
    %c0_19 = arith.constant 0 : index
    %c0_20 = arith.constant 0 : index
    %c0_21 = arith.constant 0 : index
    %21 = vector.load %arg4[%c0_19, %c0_20, %c0_21] : memref<1x32x192xbf16, #tpu.memory_space<vmem>>, vector<1x32x96xbf16>
    %22 = vector.shape_cast %21 : vector<1x32x96xbf16> to vector<32x96xbf16>
    %cst = arith.constant dense<0.000000e+00> : vector<16x96xf32>
    %23 = tpu.matmul %4, %22, %cst {dimension_numbers = #tpu.dot_dimension_numbers<[1], [0], [0], [1], [0, 0, 1, 1], [], []>} : vector<16x32xbf16>, vector<32x96xbf16>, vector<16x96xf32> -> vector<16x96xf32>
    %24 = vector.broadcast %6 : vector<1x96xf32> to vector<16x96xf32>
    %25 = arith.addf %23, %24 : vector<16x96xf32>
    %c0_22 = arith.constant 0 : index
    %c0_23 = arith.constant 0 : index
    %26 = vector.load %arg2[%c0_22, %c0_23] : memref<2x8xf32, #tpu.memory_space<vmem>>, vector<2x8xf32>
    %cst_24 = arith.constant 1.000000e+00 : f32
    %27 = vector.broadcast %cst_24 : f32 to vector<2x8xf32>
    %28 = arith.subf %27, %26 : vector<2x8xf32>
    %cst_25 = arith.constant -1.000000e+09 : f32
    %29 = vector.broadcast %cst_25 : f32 to vector<2x8xf32>
    %30 = arith.mulf %28, %29 : vector<2x8xf32>
    %31 = vector.extract_strided_slice %30 {offsets = [0, 0], sizes = [1, 8], strides = [1, 1]} : vector<2x8xf32> to vector<1x8xf32>
    %32 = vector.extract_strided_slice %25 {offsets = [0, 0], sizes = [8, 8], strides = [1, 1]} : vector<16x96xf32> to vector<8x8xf32>
    %33 = vector.extract_strided_slice %25 {offsets = [0, 32], sizes = [8, 8], strides = [1, 1]} : vector<16x96xf32> to vector<8x8xf32>
    %34 = vector.extract_strided_slice %25 {offsets = [0, 64], sizes = [8, 8], strides = [1, 1]} : vector<16x96xf32> to vector<8x8xf32>
    %35 = arith.truncf %34 : vector<8x8xf32> to vector<8x8xbf16>
    %cst_26 = arith.constant dense<0.000000e+00> : vector<8x8xf32>
    %36 = tpu.matmul %32, %33, %cst_26 {dimension_numbers = #tpu.dot_dimension_numbers<[1], [1], [0], [0], [0, 0, 1, 0], [], []>} : vector<8x8xf32>, vector<8x8xf32>, vector<8x8xf32> -> vector<8x8xf32>
    %37 = vector.broadcast %31 : vector<1x8xf32> to vector<8x8xf32>
    %38 = arith.addf %36, %37 : vector<8x8xf32>
    %cst_27 = arith.constant dense<0xFF800000> : vector<8xf32>
    %39 = vector.multi_reduction <maximumf>, %38, %cst_27 [1] : vector<8x8xf32> to vector<8xf32>
    %40 = vector.shape_cast %39 : vector<8xf32> to vector<8x1xf32>
    %41 = vector.broadcast %40 : vector<8x1xf32> to vector<8x8xf32>
    %42 = arith.subf %38, %41 : vector<8x8xf32>
    %43 = math.exp %42 : vector<8x8xf32>
    %cst_28 = arith.constant dense<0.000000e+00> : vector<8xf32>
    %44 = vector.multi_reduction <add>, %43, %cst_28 [1] : vector<8x8xf32> to vector<8xf32>
    %45 = vector.shape_cast %44 : vector<8xf32> to vector<8x1xf32>
    %46 = tpu.reciprocal %45 {approx = true} : vector<8x1xf32> -> vector<8x1xf32>
    %47 = vector.broadcast %46 : vector<8x1xf32> to vector<8x8xf32>
    %48 = arith.mulf %43, %47 : vector<8x8xf32>
    %49 = arith.truncf %48 : vector<8x8xf32> to vector<8x8xbf16>
    %cst_29 = arith.constant dense<0.000000e+00> : vector<8x8xf32>
    %50 = tpu.matmul %49, %35, %cst_29 {dimension_numbers = #tpu.dot_dimension_numbers<[1], [0], [0], [1], [0, 0, 1, 1], [], []>} : vector<8x8xbf16>, vector<8x8xbf16>, vector<8x8xf32> -> vector<8x8xf32>
    %c0_30 = arith.constant 0 : index
    %c0_31 = arith.constant 0 : index
    %51 = vector.load %arg11[%c0_30, %c0_31] : memref<16x32xf32, #tpu.memory_space<vmem>>, vector<8x8xf32>
    tpu.vector_store %arg11[%c0_30, %c0_31], %50 {strides = array<i32>} : memref<16x32xf32, #tpu.memory_space<vmem>>, vector<8x8xf32>,
    %52 = vector.extract_strided_slice %25 {offsets = [0, 8], sizes = [8, 8], strides = [1, 1]} : vector<16x96xf32> to vector<8x8xf32>
    %53 = vector.extract_strided_slice %25 {offsets = [0, 40], sizes = [8, 8], strides = [1, 1]} : vector<16x96xf32> to vector<8x8xf32>
    %54 = vector.extract_strided_slice %25 {offsets = [0, 72], sizes = [8, 8], strides = [1, 1]} : vector<16x96xf32> to vector<8x8xf32>
    %55 = arith.truncf %54 : vector<8x8xf32> to vector<8x8xbf16>
    %cst_32 = arith.constant dense<0.000000e+00> : vector<8x8xf32>
    %56 = tpu.matmul %52, %53, %cst_32 {dimension_numbers = #tpu.dot_dimension_numbers<[1], [1], [0], [0], [0, 0, 1, 0], [], []>} : vector<8x8xf32>, vector<8x8xf32>, vector<8x8xf32> -> vector<8x8xf32>
    %57 = vector.broadcast %31 : vector<1x8xf32> to vector<8x8xf32>
    %58 = arith.addf %56, %57 : vector<8x8xf32>
    %cst_33 = arith.constant dense<0xFF800000> : vector<8xf32>
    %59 = vector.multi_reduction <maximumf>, %58, %cst_33 [1] : vector<8x8xf32> to vector<8xf32>
    %60 = vector.shape_cast %59 : vector<8xf32> to vector<8x1xf32>
    %61 = vector.broadcast %60 : vector<8x1xf32> to vector<8x8xf32>
    %62 = arith.subf %58, %61 : vector<8x8xf32>
    %63 = math.exp %62 : vector<8x8xf32>
    %cst_34 = arith.constant dense<0.000000e+00> : vector<8xf32>
    %64 = vector.multi_reduction <add>, %63, %cst_34 [1] : vector<8x8xf32> to vector<8xf32>
    %65 = vector.shape_cast %64 : vector<8xf32> to vector<8x1xf32>
    %66 = tpu.reciprocal %65 {approx = true} : vector<8x1xf32> -> vector<8x1xf32>
    %67 = vector.broadcast %66 : vector<8x1xf32> to vector<8x8xf32>
    %68 = arith.mulf %63, %67 : vector<8x8xf32>
    %69 = arith.truncf %68 : vector<8x8xf32> to vector<8x8xbf16>
    %cst_35 = arith.constant dense<0.000000e+00> : vector<8x8xf32>
    %70 = tpu.matmul %69, %55, %cst_35 {dimension_numbers = #tpu.dot_dimension_numbers<[1], [0], [0], [1], [0, 0, 1, 1], [], []>} : vector<8x8xbf16>, vector<8x8xbf16>, vector<8x8xf32> -> vector<8x8xf32>
    %c0_36 = arith.constant 0 : index
    %c8 = arith.constant 8 : index
    %71 = vector.load %arg11[%c0_36, %c8] : memref<16x32xf32, #tpu.memory_space<vmem>>, vector<8x8xf32>
    tpu.vector_store %arg11[%c0_36, %c8], %70 {strides = array<i32>} : memref<16x32xf32, #tpu.memory_space<vmem>>, vector<8x8xf32>,
    %72 = vector.extract_strided_slice %25 {offsets = [0, 16], sizes = [8, 8], strides = [1, 1]} : vector<16x96xf32> to vector<8x8xf32>
    %73 = vector.extract_strided_slice %25 {offsets = [0, 48], sizes = [8, 8], strides = [1, 1]} : vector<16x96xf32> to vector<8x8xf32>
    %74 = vector.extract_strided_slice %25 {offsets = [0, 80], sizes = [8, 8], strides = [1, 1]} : vector<16x96xf32> to vector<8x8xf32>
    %75 = arith.truncf %74 : vector<8x8xf32> to vector<8x8xbf16>
    %cst_37 = arith.constant dense<0.000000e+00> : vector<8x8xf32>
    %76 = tpu.matmul %72, %73, %cst_37 {dimension_numbers = #tpu.dot_dimension_numbers<[1], [1], [0], [0], [0, 0, 1, 0], [], []>} : vector<8x8xf32>, vector<8x8xf32>, vector<8x8xf32> -> vector<8x8xf32>
    %77 = vector.broadcast %31 : vector<1x8xf32> to vector<8x8xf32>
    %78 = arith.addf %76, %77 : vector<8x8xf32>
    %cst_38 = arith.constant dense<0xFF800000> : vector<8xf32>
    %79 = vector.multi_reduction <maximumf>, %78, %cst_38 [1] : vector<8x8xf32> to vector<8xf32>
    %80 = vector.shape_cast %79 : vector<8xf32> to vector<8x1xf32>
    %81 = vector.broadcast %80 : vector<8x1xf32> to vector<8x8xf32>
    %82 = arith.subf %78, %81 : vector<8x8xf32>
    %83 = math.exp %82 : vector<8x8xf32>
    %cst_39 = arith.constant dense<0.000000e+00> : vector<8xf32>
    %84 = vector.multi_reduction <add>, %83, %cst_39 [1] : vector<8x8xf32> to vector<8xf32>
    %85 = vector.shape_cast %84 : vector<8xf32> to vector<8x1xf32>
    %86 = tpu.reciprocal %85 {approx = true} : vector<8x1xf32> -> vector<8x1xf32>
    %87 = vector.broadcast %86 : vector<8x1xf32> to vector<8x8xf32>
    %88 = arith.mulf %83, %87 : vector<8x8xf32>
    %89 = arith.truncf %88 : vector<8x8xf32> to vector<8x8xbf16>
    %cst_40 = arith.constant dense<0.000000e+00> : vector<8x8xf32>
    %90 = tpu.matmul %89, %75, %cst_40 {dimension_numbers = #tpu.dot_dimension_numbers<[1], [0], [0], [1], [0, 0, 1, 1], [], []>} : vector<8x8xbf16>, vector<8x8xbf16>, vector<8x8xf32> -> vector<8x8xf32>
    %c0_41 = arith.constant 0 : index
    %c16 = arith.constant 16 : index
    %91 = vector.load %arg11[%c0_41, %c16] : memref<16x32xf32, #tpu.memory_space<vmem>>, vector<8x8xf32>
    tpu.vector_store %arg11[%c0_41, %c16], %90 {strides = array<i32>} : memref<16x32xf32, #tpu.memory_space<vmem>>, vector<8x8xf32>,
    %92 = vector.extract_strided_slice %25 {offsets = [0, 24], sizes = [8, 8], strides = [1, 1]} : vector<16x96xf32> to vector<8x8xf32>
    %93 = vector.extract_strided_slice %25 {offsets = [0, 56], sizes = [8, 8], strides = [1, 1]} : vector<16x96xf32> to vector<8x8xf32>
    %94 = vector.extract_strided_slice %25 {offsets = [0, 88], sizes = [8, 8], strides = [1, 1]} : vector<16x96xf32> to vector<8x8xf32>
    %95 = arith.truncf %94 : vector<8x8xf32> to vector<8x8xbf16>
    %cst_42 = arith.constant dense<0.000000e+00> : vector<8x8xf32>
    %96 = tpu.matmul %92, %93, %cst_42 {dimension_numbers = #tpu.dot_dimension_numbers<[1], [1], [0], [0], [0, 0, 1, 0], [], []>} : vector<8x8xf32>, vector<8x8xf32>, vector<8x8xf32> -> vector<8x8xf32>
    %97 = vector.broadcast %31 : vector<1x8xf32> to vector<8x8xf32>
    %98 = arith.addf %96, %97 : vector<8x8xf32>
    %cst_43 = arith.constant dense<0xFF800000> : vector<8xf32>
    %99 = vector.multi_reduction <maximumf>, %98, %cst_43 [1] : vector<8x8xf32> to vector<8xf32>
    %100 = vector.shape_cast %99 : vector<8xf32> to vector<8x1xf32>
    %101 = vector.broadcast %100 : vector<8x1xf32> to vector<8x8xf32>
    %102 = arith.subf %98, %101 : vector<8x8xf32>
    %103 = math.exp %102 : vector<8x8xf32>
    %cst_44 = arith.constant dense<0.000000e+00> : vector<8xf32>
    %104 = vector.multi_reduction <add>, %103, %cst_44 [1] : vector<8x8xf32> to vector<8xf32>
    %105 = vector.shape_cast %104 : vector<8xf32> to vector<8x1xf32>
    %106 = tpu.reciprocal %105 {approx = true} : vector<8x1xf32> -> vector<8x1xf32>
    %107 = vector.broadcast %106 : vector<8x1xf32> to vector<8x8xf32>
    %108 = arith.mulf %103, %107 : vector<8x8xf32>
    %109 = arith.truncf %108 : vector<8x8xf32> to vector<8x8xbf16>
    %cst_45 = arith.constant dense<0.000000e+00> : vector<8x8xf32>
    %110 = tpu.matmul %109, %95, %cst_45 {dimension_numbers = #tpu.dot_dimension_numbers<[1], [0], [0], [1], [0, 0, 1, 1], [], []>} : vector<8x8xbf16>, vector<8x8xbf16>, vector<8x8xf32> -> vector<8x8xf32>
    %c0_46 = arith.constant 0 : index
    %c24 = arith.constant 24 : index
    %111 = vector.load %arg11[%c0_46, %c24] : memref<16x32xf32, #tpu.memory_space<vmem>>, vector<8x8xf32>
    tpu.vector_store %arg11[%c0_46, %c24], %110 {strides = array<i32>} : memref<16x32xf32, #tpu.memory_space<vmem>>, vector<8x8xf32>,
    %112 = vector.extract_strided_slice %30 {offsets = [1, 0], sizes = [1, 8], strides = [1, 1]} : vector<2x8xf32> to vector<1x8xf32>
    %113 = vector.extract_strided_slice %25 {offsets = [8, 0], sizes = [8, 8], strides = [1, 1]} : vector<16x96xf32> to vector<8x8xf32>
    %114 = vector.extract_strided_slice %25 {offsets = [8, 32], sizes = [8, 8], strides = [1, 1]} : vector<16x96xf32> to vector<8x8xf32>
    %115 = vector.extract_strided_slice %25 {offsets = [8, 64], sizes = [8, 8], strides = [1, 1]} : vector<16x96xf32> to vector<8x8xf32>
    %116 = arith.truncf %115 : vector<8x8xf32> to vector<8x8xbf16>
    %cst_47 = arith.constant dense<0.000000e+00> : vector<8x8xf32>
    %117 = tpu.matmul %113, %114, %cst_47 {dimension_numbers = #tpu.dot_dimension_numbers<[1], [1], [0], [0], [0, 0, 1, 0], [], []>} : vector<8x8xf32>, vector<8x8xf32>, vector<8x8xf32> -> vector<8x8xf32>
    %118 = vector.broadcast %112 : vector<1x8xf32> to vector<8x8xf32>
    %119 = arith.addf %117, %118 : vector<8x8xf32>
    %cst_48 = arith.constant dense<0xFF800000> : vector<8xf32>
    %120 = vector.multi_reduction <maximumf>, %119, %cst_48 [1] : vector<8x8xf32> to vector<8xf32>
    %121 = vector.shape_cast %120 : vector<8xf32> to vector<8x1xf32>
    %122 = vector.broadcast %121 : vector<8x1xf32> to vector<8x8xf32>
    %123 = arith.subf %119, %122 : vector<8x8xf32>
    %124 = math.exp %123 : vector<8x8xf32>
    %cst_49 = arith.constant dense<0.000000e+00> : vector<8xf32>
    %125 = vector.multi_reduction <add>, %124, %cst_49 [1] : vector<8x8xf32> to vector<8xf32>
    %126 = vector.shape_cast %125 : vector<8xf32> to vector<8x1xf32>
    %127 = tpu.reciprocal %126 {approx = true} : vector<8x1xf32> -> vector<8x1xf32>
    %128 = vector.broadcast %127 : vector<8x1xf32> to vector<8x8xf32>
    %129 = arith.mulf %124, %128 : vector<8x8xf32>
    %130 = arith.truncf %129 : vector<8x8xf32> to vector<8x8xbf16>
    %cst_50 = arith.constant dense<0.000000e+00> : vector<8x8xf32>
    %131 = tpu.matmul %130, %116, %cst_50 {dimension_numbers = #tpu.dot_dimension_numbers<[1], [0], [0], [1], [0, 0, 1, 1], [], []>} : vector<8x8xbf16>, vector<8x8xbf16>, vector<8x8xf32> -> vector<8x8xf32>
    %c8_51 = arith.constant 8 : index
    %c0_52 = arith.constant 0 : index
    %132 = vector.load %arg11[%c8_51, %c0_52] : memref<16x32xf32, #tpu.memory_space<vmem>>, vector<8x8xf32>
    tpu.vector_store %arg11[%c8_51, %c0_52], %131 {strides = array<i32>} : memref<16x32xf32, #tpu.memory_space<vmem>>, vector<8x8xf32>,
    %133 = vector.extract_strided_slice %25 {offsets = [8, 8], sizes = [8, 8], strides = [1, 1]} : vector<16x96xf32> to vector<8x8xf32>
    %134 = vector.extract_strided_slice %25 {offsets = [8, 40], sizes = [8, 8], strides = [1, 1]} : vector<16x96xf32> to vector<8x8xf32>
    %135 = vector.extract_strided_slice %25 {offsets = [8, 72], sizes = [8, 8], strides = [1, 1]} : vector<16x96xf32> to vector<8x8xf32>
    %136 = arith.truncf %135 : vector<8x8xf32> to vector<8x8xbf16>
    %cst_53 = arith.constant dense<0.000000e+00> : vector<8x8xf32>
    %137 = tpu.matmul %133, %134, %cst_53 {dimension_numbers = #tpu.dot_dimension_numbers<[1], [1], [0], [0], [0, 0, 1, 0], [], []>} : vector<8x8xf32>, vector<8x8xf32>, vector<8x8xf32> -> vector<8x8xf32>
    %138 = vector.broadcast %112 : vector<1x8xf32> to vector<8x8xf32>
    %139 = arith.addf %137, %138 : vector<8x8xf32>
    %cst_54 = arith.constant dense<0xFF800000> : vector<8xf32>
    %140 = vector.multi_reduction <maximumf>, %139, %cst_54 [1] : vector<8x8xf32> to vector<8xf32>
    %141 = vector.shape_cast %140 : vector<8xf32> to vector<8x1xf32>
    %142 = vector.broadcast %141 : vector<8x1xf32> to vector<8x8xf32>
    %143 = arith.subf %139, %142 : vector<8x8xf32>
    %144 = math.exp %143 : vector<8x8xf32>
    %cst_55 = arith.constant dense<0.000000e+00> : vector<8xf32>
    %145 = vector.multi_reduction <add>, %144, %cst_55 [1] : vector<8x8xf32> to vector<8xf32>
    %146 = vector.shape_cast %145 : vector<8xf32> to vector<8x1xf32>
    %147 = tpu.reciprocal %146 {approx = true} : vector<8x1xf32> -> vector<8x1xf32>
    %148 = vector.broadcast %147 : vector<8x1xf32> to vector<8x8xf32>
    %149 = arith.mulf %144, %148 : vector<8x8xf32>
    %150 = arith.truncf %149 : vector<8x8xf32> to vector<8x8xbf16>
    %cst_56 = arith.constant dense<0.000000e+00> : vector<8x8xf32>
    %151 = tpu.matmul %150, %136, %cst_56 {dimension_numbers = #tpu.dot_dimension_numbers<[1], [0], [0], [1], [0, 0, 1, 1], [], []>} : vector<8x8xbf16>, vector<8x8xbf16>, vector<8x8xf32> -> vector<8x8xf32>
    %c8_57 = arith.constant 8 : index
    %c8_58 = arith.constant 8 : index
    %152 = vector.load %arg11[%c8_57, %c8_58] : memref<16x32xf32, #tpu.memory_space<vmem>>, vector<8x8xf32>
    tpu.vector_store %arg11[%c8_57, %c8_58], %151 {strides = array<i32>} : memref<16x32xf32, #tpu.memory_space<vmem>>, vector<8x8xf32>,
    %153 = vector.extract_strided_slice %25 {offsets = [8, 16], sizes = [8, 8], strides = [1, 1]} : vector<16x96xf32> to vector<8x8xf32>
    %154 = vector.extract_strided_slice %25 {offsets = [8, 48], sizes = [8, 8], strides = [1, 1]} : vector<16x96xf32> to vector<8x8xf32>
    %155 = vector.extract_strided_slice %25 {offsets = [8, 80], sizes = [8, 8], strides = [1, 1]} : vector<16x96xf32> to vector<8x8xf32>
    %156 = arith.truncf %155 : vector<8x8xf32> to vector<8x8xbf16>
    %cst_59 = arith.constant dense<0.000000e+00> : vector<8x8xf32>
    %157 = tpu.matmul %153, %154, %cst_59 {dimension_numbers = #tpu.dot_dimension_numbers<[1], [1], [0], [0], [0, 0, 1, 0], [], []>} : vector<8x8xf32>, vector<8x8xf32>, vector<8x8xf32> -> vector<8x8xf32>
    %158 = vector.broadcast %112 : vector<1x8xf32> to vector<8x8xf32>
    %159 = arith.addf %157, %158 : vector<8x8xf32>
    %cst_60 = arith.constant dense<0xFF800000> : vector<8xf32>
    %160 = vector.multi_reduction <maximumf>, %159, %cst_60 [1] : vector<8x8xf32> to vector<8xf32>
    %161 = vector.shape_cast %160 : vector<8xf32> to vector<8x1xf32>
    %162 = vector.broadcast %161 : vector<8x1xf32> to vector<8x8xf32>
    %163 = arith.subf %159, %162 : vector<8x8xf32>
    %164 = math.exp %163 : vector<8x8xf32>
    %cst_61 = arith.constant dense<0.000000e+00> : vector<8xf32>
    %165 = vector.multi_reduction <add>, %164, %cst_61 [1] : vector<8x8xf32> to vector<8xf32>
    %166 = vector.shape_cast %165 : vector<8xf32> to vector<8x1xf32>
    %167 = tpu.reciprocal %166 {approx = true} : vector<8x1xf32> -> vector<8x1xf32>
    %168 = vector.broadcast %167 : vector<8x1xf32> to vector<8x8xf32>
    %169 = arith.mulf %164, %168 : vector<8x8xf32>
    %170 = arith.truncf %169 : vector<8x8xf32> to vector<8x8xbf16>
    %cst_62 = arith.constant dense<0.000000e+00> : vector<8x8xf32>
    %171 = tpu.matmul %170, %156, %cst_62 {dimension_numbers = #tpu.dot_dimension_numbers<[1], [0], [0], [1], [0, 0, 1, 1], [], []>} : vector<8x8xbf16>, vector<8x8xbf16>, vector<8x8xf32> -> vector<8x8xf32>
    %c8_63 = arith.constant 8 : index
    %c16_64 = arith.constant 16 : index
    %172 = vector.load %arg11[%c8_63, %c16_64] : memref<16x32xf32, #tpu.memory_space<vmem>>, vector<8x8xf32>
    tpu.vector_store %arg11[%c8_63, %c16_64], %171 {strides = array<i32>} : memref<16x32xf32, #tpu.memory_space<vmem>>, vector<8x8xf32>,
    %173 = vector.extract_strided_slice %25 {offsets = [8, 24], sizes = [8, 8], strides = [1, 1]} : vector<16x96xf32> to vector<8x8xf32>
    %174 = vector.extract_strided_slice %25 {offsets = [8, 56], sizes = [8, 8], strides = [1, 1]} : vector<16x96xf32> to vector<8x8xf32>
    %175 = vector.extract_strided_slice %25 {offsets = [8, 88], sizes = [8, 8], strides = [1, 1]} : vector<16x96xf32> to vector<8x8xf32>
    %176 = arith.truncf %175 : vector<8x8xf32> to vector<8x8xbf16>
    %cst_65 = arith.constant dense<0.000000e+00> : vector<8x8xf32>
    %177 = tpu.matmul %173, %174, %cst_65 {dimension_numbers = #tpu.dot_dimension_numbers<[1], [1], [0], [0], [0, 0, 1, 0], [], []>} : vector<8x8xf32>, vector<8x8xf32>, vector<8x8xf32> -> vector<8x8xf32>
    %178 = vector.broadcast %112 : vector<1x8xf32> to vector<8x8xf32>
    %179 = arith.addf %177, %178 : vector<8x8xf32>
    %cst_66 = arith.constant dense<0xFF800000> : vector<8xf32>
    %180 = vector.multi_reduction <maximumf>, %179, %cst_66 [1] : vector<8x8xf32> to vector<8xf32>
    %181 = vector.shape_cast %180 : vector<8xf32> to vector<8x1xf32>
    %182 = vector.broadcast %181 : vector<8x1xf32> to vector<8x8xf32>
    %183 = arith.subf %179, %182 : vector<8x8xf32>
    %184 = math.exp %183 : vector<8x8xf32>
    %cst_67 = arith.constant dense<0.000000e+00> : vector<8xf32>
    %185 = vector.multi_reduction <add>, %184, %cst_67 [1] : vector<8x8xf32> to vector<8xf32>
    %186 = vector.shape_cast %185 : vector<8xf32> to vector<8x1xf32>
    %187 = tpu.reciprocal %186 {approx = true} : vector<8x1xf32> -> vector<8x1xf32>
    %188 = vector.broadcast %187 : vector<8x1xf32> to vector<8x8xf32>
    %189 = arith.mulf %184, %188 : vector<8x8xf32>
    %190 = arith.truncf %189 : vector<8x8xf32> to vector<8x8xbf16>
    %cst_68 = arith.constant dense<0.000000e+00> : vector<8x8xf32>
    %191 = tpu.matmul %190, %176, %cst_68 {dimension_numbers = #tpu.dot_dimension_numbers<[1], [0], [0], [1], [0, 0, 1, 1], [], []>} : vector<8x8xbf16>, vector<8x8xbf16>, vector<8x8xf32> -> vector<8x8xf32>
    %c8_69 = arith.constant 8 : index
    %c24_70 = arith.constant 24 : index
    %192 = vector.load %arg11[%c8_69, %c24_70] : memref<16x32xf32, #tpu.memory_space<vmem>>, vector<8x8xf32>
    tpu.vector_store %arg11[%c8_69, %c24_70], %191 {strides = array<i32>} : memref<16x32xf32, #tpu.memory_space<vmem>>, vector<8x8xf32>,
    %c0_71 = arith.constant 0 : index
    %c0_72 = arith.constant 0 : index
    %193 = vector.load %arg11[%c0_71, %c0_72] : memref<16x32xf32, #tpu.memory_space<vmem>>, vector<16x32xf32>
    %194 = arith.truncf %193 : vector<16x32xf32> to vector<16x32xbf16>
    %c0_73 = arith.constant 0 : index
    %c0_74 = arith.constant 0 : index
    %c96_75 = arith.constant 96 : index
    %195 = vector.load %arg4[%c0_73, %c0_74, %c96_75] : memref<1x32x192xbf16, #tpu.memory_space<vmem>>, vector<1x32x32xbf16>
    %196 = vector.shape_cast %195 : vector<1x32x32xbf16> to vector<32x32xbf16>
    %cst_76 = arith.constant dense<0.000000e+00> : vector<16x32xf32>
    %197 = tpu.matmul %194, %196, %cst_76 {dimension_numbers = #tpu.dot_dimension_numbers<[1], [0], [0], [1], [0, 0, 1, 1], [], []>} : vector<16x32xbf16>, vector<32x32xbf16>, vector<16x32xf32> -> vector<16x32xf32>
    %198 = vector.broadcast %8 : vector<1x32xf32> to vector<16x32xf32>
    %199 = arith.addf %197, %198 : vector<16x32xf32>
    %200 = arith.addf %199, %3 : vector<16x32xf32>
    %cst_77 = arith.constant dense<0.000000e+00> : vector<16xf32>
    %201 = vector.multi_reduction <add>, %200, %cst_77 [1] : vector<16x32xf32> to vector<16xf32>
    %202 = vector.shape_cast %201 : vector<16xf32> to vector<16x1xf32>
    %cst_78 = arith.constant 3.200000e+01 : f32
    %203 = vector.broadcast %cst_78 : f32 to vector<16x1xf32>
    %204 = arith.divf %202, %203 : vector<16x1xf32>
    %205 = vector.broadcast %204 : vector<16x1xf32> to vector<16x32xf32>
    %206 = arith.subf %200, %205 : vector<16x32xf32>
    %207 = vector.broadcast %204 : vector<16x1xf32> to vector<16x32xf32>
    %208 = arith.subf %200, %207 : vector<16x32xf32>
    %209 = arith.mulf %206, %208 : vector<16x32xf32>
    %cst_79 = arith.constant dense<0.000000e+00> : vector<16xf32>
    %210 = vector.multi_reduction <add>, %209, %cst_79 [1] : vector<16x32xf32> to vector<16xf32>
    %211 = vector.shape_cast %210 : vector<16xf32> to vector<16x1xf32>
    %cst_80 = arith.constant 3.200000e+01 : f32
    %212 = vector.broadcast %cst_80 : f32 to vector<16x1xf32>
    %213 = arith.divf %211, %212 : vector<16x1xf32>
    %214 = vector.broadcast %204 : vector<16x1xf32> to vector<16x32xf32>
    %215 = arith.subf %200, %214 : vector<16x32xf32>
    %cst_81 = arith.constant 9.99999974E-6 : f32
    %216 = vector.broadcast %cst_81 : f32 to vector<16x1xf32>
    %217 = arith.addf %213, %216 : vector<16x1xf32>
    %218 = math.rsqrt %217 : vector<16x1xf32>
    %219 = vector.broadcast %218 : vector<16x1xf32> to vector<16x32xf32>
    %220 = arith.mulf %215, %219 : vector<16x32xf32>
    %221 = vector.broadcast %10 : vector<1x32xf32> to vector<16x32xf32>
    %222 = arith.mulf %220, %221 : vector<16x32xf32>
    %223 = vector.broadcast %12 : vector<1x32xf32> to vector<16x32xf32>
    %224 = arith.addf %222, %223 : vector<16x32xf32>
    %225 = arith.truncf %224 : vector<16x32xf32> to vector<16x32xbf16>
    %c0_82 = arith.constant 0 : index
    %c0_83 = arith.constant 0 : index
    %c128_84 = arith.constant 128 : index
    %226 = vector.load %arg4[%c0_82, %c0_83, %c128_84] : memref<1x32x192xbf16, #tpu.memory_space<vmem>>, vector<1x32x64xbf16>
    %227 = vector.shape_cast %226 : vector<1x32x64xbf16> to vector<32x64xbf16>
    %cst_85 = arith.constant dense<0.000000e+00> : vector<16x64xf32>
    %228 = tpu.matmul %225, %227, %cst_85 {dimension_numbers = #tpu.dot_dimension_numbers<[1], [0], [0], [1], [0, 0, 1, 1], [], []>} : vector<16x32xbf16>, vector<32x64xbf16>, vector<16x64xf32> -> vector<16x64xf32>
    %229 = vector.broadcast %14 : vector<1x64xf32> to vector<16x64xf32>
    %230 = arith.addf %228, %229 : vector<16x64xf32>
    %cst_86 = arith.constant 5.000000e-01 : f32
    %231 = vector.broadcast %cst_86 : f32 to vector<16x64xf32>
    %232 = arith.mulf %231, %230 : vector<16x64xf32>
    %cst_87 = arith.constant 0.707106769 : f32
    %233 = vector.broadcast %cst_87 : f32 to vector<16x64xf32>
    %234 = arith.mulf %230, %233 : vector<16x64xf32>
    %235 = math.erf %234 : vector<16x64xf32>
    %cst_88 = arith.constant 1.000000e+00 : f32
    %236 = vector.broadcast %cst_88 : f32 to vector<16x64xf32>
    %237 = arith.addf %236, %235 : vector<16x64xf32>
    %238 = arith.mulf %232, %237 : vector<16x64xf32>
    %239 = arith.truncf %238 : vector<16x64xf32> to vector<16x64xbf16>
    %c0_89 = arith.constant 0 : index
    %c0_90 = arith.constant 0 : index
    %c0_91 = arith.constant 0 : index
    %240 = vector.load %arg5[%c0_89, %c0_90, %c0_91] : memref<1x64x32xbf16, #tpu.memory_space<vmem>>, vector<1x64x32xbf16>
    %241 = vector.shape_cast %240 : vector<1x64x32xbf16> to vector<64x32xbf16>
    %cst_92 = arith.constant dense<0.000000e+00> : vector<16x32xf32>
    %242 = tpu.matmul %239, %241, %cst_92 {dimension_numbers = #tpu.dot_dimension_numbers<[1], [0], [0], [1], [0, 0, 1, 1], [], []>} : vector<16x64xbf16>, vector<64x32xbf16>, vector<16x32xf32> -> vector<16x32xf32>
    %243 = vector.broadcast %16 : vector<1x32xf32> to vector<16x32xf32>
    %244 = arith.addf %242, %243 : vector<16x32xf32>
    %245 = arith.addf %244, %224 : vector<16x32xf32>
    %cst_93 = arith.constant dense<0.000000e+00> : vector<16xf32>
    %246 = vector.multi_reduction <add>, %245, %cst_93 [1] : vector<16x32xf32> to vector<16xf32>
    %247 = vector.shape_cast %246 : vector<16xf32> to vector<16x1xf32>
    %cst_94 = arith.constant 3.200000e+01 : f32
    %248 = vector.broadcast %cst_94 : f32 to vector<16x1xf32>
    %249 = arith.divf %247, %248 : vector<16x1xf32>
    %250 = vector.broadcast %249 : vector<16x1xf32> to vector<16x32xf32>
    %251 = arith.subf %245, %250 : vector<16x32xf32>
    %252 = vector.broadcast %249 : vector<16x1xf32> to vector<16x32xf32>
    %253 = arith.subf %245, %252 : vector<16x32xf32>
    %254 = arith.mulf %251, %253 : vector<16x32xf32>
    %cst_95 = arith.constant dense<0.000000e+00> : vector<16xf32>
    %255 = vector.multi_reduction <add>, %254, %cst_95 [1] : vector<16x32xf32> to vector<16xf32>
    %256 = vector.shape_cast %255 : vector<16xf32> to vector<16x1xf32>
    %cst_96 = arith.constant 3.200000e+01 : f32
    %257 = vector.broadcast %cst_96 : f32 to vector<16x1xf32>
    %258 = arith.divf %256, %257 : vector<16x1xf32>
    %259 = vector.broadcast %249 : vector<16x1xf32> to vector<16x32xf32>
    %260 = arith.subf %245, %259 : vector<16x32xf32>
    %cst_97 = arith.constant 9.99999974E-6 : f32
    %261 = vector.broadcast %cst_97 : f32 to vector<16x1xf32>
    %262 = arith.addf %258, %261 : vector<16x1xf32>
    %263 = math.rsqrt %262 : vector<16x1xf32>
    %264 = vector.broadcast %263 : vector<16x1xf32> to vector<16x32xf32>
    %265 = arith.mulf %260, %264 : vector<16x32xf32>
    %266 = vector.broadcast %18 : vector<1x32xf32> to vector<16x32xf32>
    %267 = arith.mulf %265, %266 : vector<16x32xf32>
    %268 = vector.broadcast %20 : vector<1x32xf32> to vector<16x32xf32>
    %269 = arith.addf %267, %268 : vector<16x32xf32>
    %c0_98 = arith.constant 0 : index
    %c0_99 = arith.constant 0 : index
    %270 = vector.load %arg10[%c0_98, %c0_99] : memref<16x32xf32, #tpu.memory_space<vmem>>, vector<16x32xf32>
    tpu.vector_store %arg10[%c0_98, %c0_99], %269 {strides = array<i32>} : memref<16x32xf32, #tpu.memory_space<vmem>>, vector<16x32xf32>,
    %c1_i32 = arith.constant 1 : i32
    %271 = arith.cmpi eq, %arg0, %c1_i32 : i32
    %272 = arith.extui %271 : i1 to i32
    %c0_i32_100 = arith.constant 0 : i32
    %273 = arith.cmpi ne, %272, %c0_i32_100 : i32
    scf.if %273 {
      %274 = vector.extract_strided_slice %269 {offsets = [0, 0], sizes = [1, 32], strides = [1, 1]} : vector<16x32xf32> to vector<1x32xf32>
      %275 = vector.extract_strided_slice %269 {offsets = [8, 0], sizes = [1, 32], strides = [1, 1]} : vector<16x32xf32> to vector<1x32xf32>
      %276 = tpu.concatenate %274, %275 in 0 : vector<1x32xf32>, vector<1x32xf32> -> vector<2x32xf32>
      %277 = arith.truncf %276 : vector<2x32xf32> to vector<2x32xbf16>
      %c0_101 = arith.constant 0 : index
      %c0_102 = arith.constant 0 : index
      %278 = vector.load %arg7[%c0_101, %c0_102] : memref<32x34xbf16, #tpu.memory_space<vmem>>, vector<32x32xbf16>
      %cst_103 = arith.constant dense<0.000000e+00> : vector<2x32xf32>
      %279 = tpu.matmul %277, %278, %cst_103 {dimension_numbers = #tpu.dot_dimension_numbers<[1], [0], [0], [1], [0, 0, 1, 1], [], []>} : vector<2x32xbf16>, vector<32x32xbf16>, vector<2x32xf32> -> vector<2x32xf32>
      %c0_104 = arith.constant 0 : index
      %c0_105 = arith.constant 0 : index
      %280 = vector.load %arg8[%c0_104, %c0_105] : memref<1x34xf32, #tpu.memory_space<vmem>>, vector<1x32xf32>
      %281 = vector.broadcast %280 : vector<1x32xf32> to vector<2x32xf32>
      %282 = arith.addf %279, %281 : vector<2x32xf32>
      %cst_106 = arith.constant 0.000000e+00 : f32
      %283 = vector.broadcast %cst_106 : f32 to vector<2x32xf32>
      %284 = arith.maximumf %282, %283 : vector<2x32xf32>
      %285 = arith.truncf %284 : vector<2x32xf32> to vector<2x32xbf16>
      %c0_107 = arith.constant 0 : index
      %c32 = arith.constant 32 : index
      %286 = vector.load %arg7[%c0_107, %c32] : memref<32x34xbf16, #tpu.memory_space<vmem>>, vector<32x2xbf16>
      %cst_108 = arith.constant dense<0.000000e+00> : vector<2x2xf32>
      %287 = tpu.matmul %285, %286, %cst_108 {dimension_numbers = #tpu.dot_dimension_numbers<[1], [0], [0], [1], [0, 0, 1, 1], [], []>} : vector<2x32xbf16>, vector<32x2xbf16>, vector<2x2xf32> -> vector<2x2xf32>
      %c0_109 = arith.constant 0 : index
      %c32_110 = arith.constant 32 : index
      %288 = vector.load %arg8[%c0_109, %c32_110] : memref<1x34xf32, #tpu.memory_space<vmem>>, vector<1x2xf32>
      %289 = vector.broadcast %288 : vector<1x2xf32> to vector<2x2xf32>
      %290 = arith.addf %287, %289 : vector<2x2xf32>
      %cst_111 = arith.constant dense<0xFF800000> : vector<2xf32>
      %291 = vector.multi_reduction <maximumf>, %290, %cst_111 [1] : vector<2x2xf32> to vector<2xf32>
      %292 = vector.shape_cast %291 : vector<2xf32> to vector<2x1xf32>
      %293 = vector.broadcast %292 : vector<2x1xf32> to vector<2x2xf32>
      %294 = arith.subf %290, %293 : vector<2x2xf32>
      %295 = math.exp %294 : vector<2x2xf32>
      %cst_112 = arith.constant dense<0.000000e+00> : vector<2xf32>
      %296 = vector.multi_reduction <add>, %295, %cst_112 [1] : vector<2x2xf32> to vector<2xf32>
      %297 = vector.shape_cast %296 : vector<2xf32> to vector<2x1xf32>
      %298 = vector.broadcast %297 : vector<2x1xf32> to vector<2x2xf32>
      %299 = arith.divf %295, %298 : vector<2x2xf32>
      %c0_113 = arith.constant 0 : index
      %c0_114 = arith.constant 0 : index
      %300 = vector.load %arg9[%c0_113, %c0_114] : memref<2x2xf32, #tpu.memory_space<vmem>>, vector<2x2xf32>
      tpu.vector_store %arg9[%c0_113, %c0_114], %299 {strides = array<i32>} : memref<2x2xf32, #tpu.memory_space<vmem>>, vector<2x2xf32>,
    } else {
    }
    return
  }
  func.func @transform_0(%arg0: i32) -> (i32, i32) {
    %c0_i32 = arith.constant 0 : i32
    %c0_i32_0 = arith.constant 0 : i32
    %c0_i32_1 = arith.constant 0 : i32
    return %c0_i32, %c0_i32_0 : i32, i32
  }
  func.func @transform_1(%arg0: i32) -> (i32, i32) {
    %c0_i32 = arith.constant 0 : i32
    %c0_i32_0 = arith.constant 0 : i32
    %c0_i32_1 = arith.constant 0 : i32
    return %c0_i32, %c0_i32_0 : i32, i32
  }
  func.func @transform_2(%arg0: i32) -> (i32, i32) {
    %c0_i32 = arith.constant 0 : i32
    %c0_i32_0 = arith.constant 0 : i32
    %c0_i32_1 = arith.constant 0 : i32
    return %c0_i32, %c0_i32_0 : i32, i32
  }
  func.func @transform_3(%arg0: i32) -> (i32, i32, i32) {
    %c0_i32 = arith.constant 0 : i32
    %c0_i32_0 = arith.constant 0 : i32
    %c0_i32_1 = arith.constant 0 : i32
    return %arg0, %c0_i32, %c0_i32_0 : i32, i32, i32
  }
  func.func @transform_4(%arg0: i32) -> (i32, i32, i32) {
    %c0_i32 = arith.constant 0 : i32
    %c0_i32_0 = arith.constant 0 : i32
    %c0_i32_1 = arith.constant 0 : i32
    return %arg0, %c0_i32, %c0_i32_0 : i32, i32, i32
  }
  func.func @transform_5(%arg0: i32) -> (i32, i32, i32) {
    %c0_i32 = arith.constant 0 : i32
    %c0_i32_0 = arith.constant 0 : i32
    %c0_i32_1 = arith.constant 0 : i32
    return %arg0, %c0_i32, %c0_i32_0 : i32, i32, i32
  }
  func.func @transform_6(%arg0: i32) -> (i32, i32) {
    %c0_i32 = arith.constant 0 : i32
    %c0_i32_0 = arith.constant 0 : i32
    %c0_i32_1 = arith.constant 0 : i32
    return %c0_i32, %c0_i32_0 : i32, i32
  }
  func.func @transform_7(%arg0: i32) -> (i32, i32) {
    %c0_i32 = arith.constant 0 : i32
    %c0_i32_0 = arith.constant 0 : i32
    %c0_i32_1 = arith.constant 0 : i32
    return %c0_i32, %c0_i32_0 : i32, i32
  }
  func.func @transform_8(%arg0: i32) -> (i32, i32) {
    %c0_i32 = arith.constant 0 : i32
    %c0_i32_0 = arith.constant 0 : i32
    %c0_i32_1 = arith.constant 0 : i32
    return %c0_i32, %c0_i32_0 : i32, i32
  }
}

</mosaic_0001>

<bundles_post_ra>
// kernel: fwd.1
= control target key start
LH: loop header
LB: loop body
LE: loop exit
PB: predicated region body
PF: predicated region fallthrough
CT: control target
= control target key end

     0   :  { %13 = vsyncpa [#allocation5], 0  ;;  %s1799_s27 = smov 0   ;;  %s2092_s0 = inlined_call_operand.vmem [shape: f32[16,32], index: 0, kind: input, shape index: {}]   ;;  %s2093_s1 = inlined_call_operand.vmem [shape: f32[2,8], index: 1, kind: input, shape index: {}]   ;;  %s2094_s2 = inlined_call_operand.vmem [shape: f32[1,64], index: 2, kind: input, shape index: {}]   ;;  %s2095_s3 = inlined_call_operand.vmem [shape: bf16[2,32,192], index: 3, kind: input, shape index: {}]   ;;  %s2096_s4 = inlined_call_operand.vmem [shape: bf16[2,64,32], index: 4, kind: input, shape index: {}]   ;;  %s2097_s5 = inlined_call_operand.vmem [shape: f32[2,1,352], index: 5, kind: input, shape index: {}]   ;;  %s2098_s6 = inlined_call_operand.vmem [shape: bf16[32,34], index: 6, kind: input, shape index: {}]   ;;  %s2099_s7 = inlined_call_operand.vmem [shape: f32[1,34], index: 7, kind: input, shape index: {}]   ;;  %s2100_s8 = inlined_call_operand.hbm [shape: f32[2,2], index: 8, kind: output, shape index: {}]  }
   0x1 LB: > { %s1805_s28 = sadd.s32 4294967295, %s1732_s27   ;;  %p1493_p0 = scmp.ge.s32.totalorder %s1732_s27, 1  ;;  %s1732_s27 = sphi %s1799_s27, %s19_s27  }
   0x2   : > { %p277_p1 = scmp.lt.s32.totalorder %s1732_s27, 3 }
   0x4   : > { %p278_p2 = pnand %p1493_p0, %p277_p1 }
   0x5   : > { %p315_p3 = scmp.lt.s32.totalorder (!%p278_p2), %s1805_s28, 1  ;;  %p1498_p4 = scmp.ne.s32.totalorder (!%p278_p2), %s1805_s28, 0 }
   0x6   : > { %281 = sbr.rel (%p278_p2) target bundleno = 3560 (0xde8), region = 52 }
   0xb   : > { %s316_s29 = scalar_select %p315_p3, %s1805_s28, 1 }
   0xc   : > { %333 = sbr.rel (%p1498_p4) target bundleno = 295 (0x127), region = 56  ;;  %s1735_s25 = smov (!%p1498_p4), 96  }
   0xd   : > { %s1584_s30 = sshll.u32 %s316_s29, 5  ;;  %s1598_s9 = smul.u32 3, %s316_s29 }
   0xe   : > { %s1814_s12 = scalar_lea.vmem %s2095_s3, %s1584_s30  ;;  %s1819_s15 = scalar_lea.vmem %s2096_s4, %s1584_s30 }
   0xf   : > { %s1824_s18 = scalar_lea.vmem %s2097_s5, %s1598_s9 }
  0x11   : > { %v334_v0 = vld [vmem:[%s2092_s0] sm:$0xff]  ;;  %vm337_vm0 = vcmask 261120   ;;  %v335_v2 = vld [vmem:[%s2092_s0 + $0x8] sm:$0xff]  ;;  %v1734_v4 = vmov 32.0  }
  0x12   : > { %v338_v1 = vsel %vm337_vm0, %v334_v0, 0.0  ;;  %v341_v3 = vsel %vm337_vm0, %v335_v2, 0.0  ;;  %1634 = vrcp.f32 %v1734_v4  ;;  %v1633_v7 = vld [vmem:[%s2094_s2] ss:$0 sm:$0xff] }
  0x13   : > { %339 = vadd.xlane.f32.xlu0 %v338_v1  ;;  %394 = vrot.lane.b32.xlu2 %v1633_v7, %s1735_s25 }
  0x18   : > { %v1635_v5 = vpop.eup %1634 }
  0x19   : > { %v345_v6 = vmul.f32 32.0, %v1635_v5  ;;  %vm349_vm1 = vweird.f32 %v1635_v5 }
  0x1b   : > { %342 = vadd.xlane.f32.xlu0 %v341_v3  ;;  %v346_v8 = vsub.f32 1.0, %v345_v6 }
  0x1d   : > { %v347_v9 = vmul.f32 %v1635_v5, %v346_v8 }
  0x1f   : > { %v348_v10 = vadd.f32 %v1635_v5, %v347_v9 }
  0x21   : > { %v350_v11 = vsel %vm349_vm1, %v1635_v5, %v348_v10 }
  0x6d   : > { %v395_v40 = vpop.permute.xlu2 %394 }
  0x86   : > { %v340_v12 = vpop.xlane.xlu0 %339 }
  0x87   : > { %v351_v13 = vmul.f32 %v350_v11, %v340_v12 }
  0x89   : > { %v353_v14 = vsub.f32 %v334_v0, %v351_v13 }
  0x8b   : > { %v355_v15 = vmul.f32 %v353_v14, %v353_v14 }
  0x8d   : > { %v357_v16 = vsel %vm337_vm0, %v355_v15, 0.0 }
  0x8e   : > { %358 = vadd.xlane.f32.xlu1 %v357_v16  ;;  %v343_v17 = vpop.xlane.xlu0 %342 }
  0x8f   : > { %v352_v18 = vmul.f32 %v350_v11, %v343_v17 }
  0x91   : > { %v354_v19 = vsub.f32 %v335_v2, %v352_v18 }
  0x93   : > { %v356_v20 = vmul.f32 %v354_v19, %v354_v19 }
  0x95   : > { %v360_v21 = vsel %vm337_vm0, %v356_v20, 0.0 }
  0x96   : > { %361 = vadd.xlane.f32.xlu1 %v360_v21 }
 0x101   : > { %v359_v22 = vpop.xlane.xlu1 %358 }
 0x102   : > { %v363_v23 = vmul.f32 %v359_v22, %v350_v11 }
 0x104   : > { %v365_v24 = vadd.f32 1e-05, %v363_v23 }
 0x106   : > { %1636 = vrsqrt.f32 %v365_v24  ;;  %vm373_vm3 = vweird.f32 %v365_v24 }
 0x109   : > { %v362_v25 = vpop.xlane.xlu1 %361 }
 0x10a   : > { %v364_v26 = vmul.f32 %v362_v25, %v350_v11 }
 0x10c   : > { %v1637_v27 = vpop.eup %1636  ;;  %v366_v28 = vadd.f32 1e-05, %v364_v26 }
 0x10d   : > { %v368_v29 = vmul.f32 %v1637_v27, %v365_v24  ;;  %vm374_vm2 = vweird.f32 %v1637_v27 }
 0x10e   : > { %1638 = vrsqrt.f32 %v366_v28  ;;  %vm375_vm4 = vmor %vm373_vm3, %vm374_vm2  ;;  %vm383_vm6 = vweird.f32 %v366_v28 }
 0x10f   : > { %v369_v30 = vmul.f32 %v1637_v27, %v368_v29 }
 0x111   : > { %v370_v31 = vmul.f32 0.5, %v369_v30 }
 0x113   : > { %v371_v32 = vsub.f32 1.5, %v370_v31 }
 0x114   : > { %v1639_v33 = vpop.eup %1638 }
 0x115   : > { %v378_v34 = vmul.f32 %v1639_v33, %v366_v28  ;;  %v372_v35 = vmul.f32 %v1637_v27, %v371_v32  ;;  %vm384_vm5 = vweird.f32 %v1639_v33 }
 0x116   : > { %vm385_vm7 = vmor %vm383_vm6, %vm384_vm5 }
 0x117   : > { %v379_v36 = vmul.f32 %v1639_v33, %v378_v34  ;;  %v376_v37 = vsel %vm375_vm4, %v1637_v27, %v372_v35 }
 0x118   : > { %v387_v38 = vmul.f32 %v376_v37, %v353_v14 }
 0x119   : > { %v380_v39 = vmul.f32 0.5, %v379_v36 }
 0x11a   : > { %v392_v41 = vmul.f32 %v1633_v7, %v387_v38 }
 0x11b   : > { %v381_v42 = vsub.f32 1.5, %v380_v39 }
 0x11c   : > { %v397_v43 = vadd.f32 %v395_v40, %v392_v41 }
 0x11d   : > { %v382_v44 = vmul.f32 %v1639_v33, %v381_v42 }
 0x11e   : > { %399 = vst.msk [vmem:[#allocation2] sm:$0xff] %vm337_vm0, %v397_v43 }
 0x11f   : > { %v386_v45 = vsel %vm385_vm7, %v1639_v33, %v382_v44 }
 0x120   : > { %v388_v46 = vmul.f32 %v386_v45, %v354_v19 }
 0x122   : > { %v393_v47 = vmul.f32 %v1633_v7, %v388_v46 }
 0x124   : > { %v398_v48 = vadd.f32 %v395_v40, %v393_v47 }
 0x126   : > { %400 = vst.msk [vmem:[#allocation2 + $0x8] sm:$0xff] %vm337_vm0, %v398_v48 }
 0x127 PF: > { %v1505_v49 = vld [vmem:[%s1814_s12 + $0x10] sm:$0xf]  ;;  %v1587_v50 = vld [vmem:[%s1814_s12 + $0x14] sm:$0xf0]  ;;  %v1501_v51 = vld [vmem:[%s1814_s12] sm:$0xf] }
 0x128   : > { %v1506_v52 = vor.u32 %v1587_v50, %v1505_v49  ;;  %v1586_v53 = vld [vmem:[%s1814_s12 + $0x4] sm:$0xf0]  ;;  %v1846_v55 = vld [vmem:[#allocation2] sm:$0xff]  ;;  %vm426_vm8 = vcmask 261120   ;;  %s1736_s26 = smov 88   ;;  %s1737_s29 = smov 56  }
 0x129   : > { %v1502_v54 = vor.u32 %v1586_v53, %v1501_v51  ;;  %v1854_v58 = vld [vmem:[%s1824_s18] ss:$0 sm:$0xff]  ;;  %s1738_s30 = smov 120   ;;  %s1739_s9 = smov 80   ;;  %vm495_vm9 = vcmask 1043456   ;;  %vm452_vm10 = vcmask 64512  }
 0x12a   : > { %436 = vmatpush.bf16.msra.mxu0 %v1506_v52  ;;  %s1740_s10 = smov 112   ;;  %s1741_s11 = smov 96   ;;  %v444_v7 = vld [vmem:[%s2093_s1] sm:$0x3]  ;;  %vm578_vm11 = vcmask 130112   ;;  %vm645_vm12 = vcmask 195712  }
 0x12b   : > { %s1742_s13 = smov 104   ;;  %v445_v8 = vsub.f32 1.0, %v444_v7  ;;  %s1743_s17 = smov 72   ;;  %vm712_vm13 = vcmask 261312  }
 0x12c   : > { %s1744_s19 = smov 40   ;;  %s1745_s20 = smov 64  }
 0x12d   : > { %v1848_v56 = vld [vmem:[#allocation2 + $0x8] sm:$0xff]  ;;  %v446_v9 = vmul.f32 -1e+09, %v445_v8  ;;  %s1746_s21 = smov 48   ;;  %s1747_s22 = smov 8  }
 0x12e   : > { %v403_v57 = vpack.c.bf16 %v1848_v56, %v1846_v55  ;;  %437 = vmatpush.bf16.msra.mxu0 %v1502_v54  ;;  %s1748_s23 = smov 16   ;;  %s1749_s24 = smov 24  }
 0x12f   : > { %v1889_v10 = vperm.slane %v446_v9, 0  ;;  %v1908_v28 = vperm.slane %v446_v9, 1  ;;  %s1750_s25 = smov 32   ;;  %p1569_p5 = scmp.ne.s32.totalorder %s1805_s28, 1 }
 0x131   : > { %1507 = vmatmul.msk.bf16.vlgmr.msra.gmra.mxu0 %vm426_vm8, %v403_v57 }
 0x1ae   : > { %v439_v59 = vpop.f32.mrf.mxu0 }
 0x1af   : > { %v1857_v60 = vadd.f32 %v1854_v58, %v439_v59 }
 0x1b1   : > { %515 = vrot.lane.b32.xlu0 %v1857_v60, %s1736_s26  ;;  %v1863_v61 = vpack.c.bf16 %v1857_v60, %v1857_v60 }
 0x1b3   : > { %553 = vrot.lane.b32.xlu2 %v1863_v61, %s1737_s29 }
 0x1b6   : > { %v441_v62 = vpop.f32.mrf.mxu0 }
 0x1b7   : > { %v1872_v63 = vadd.f32 %v1854_v58, %v441_v62 }
 0x1b9   : > { %513 = vrot.lane.b32.xlu0 %v1857_v60, %s1738_s30  ;;  %v1929_v48 = vpack.c.bf16 %v1872_v63, %v1872_v63 }
 0x1bb   : > { %582 = vrot.lane.b32.xlu2 %v1857_v60, %s1739_s9 }
 0x1c1   : > { %580 = vrot.lane.b32.xlu0 %v1857_v60, %s1740_s10 }
 0x1c3   : > { %717 = vrot.lane.b32.xlu2 %v1872_v63, %s1741_s11 }
 0x1c9   : > { %647 = vrot.lane.b32.xlu0 %v1857_v60, %s1742_s13 }
 0x20d   : > { %v554_v0 = vpop.permute.xlu2 %553 }
 0x20e   : > { %v559_v1 = vsel %vm495_vm9, %v554_v0, 0 }
 0x20f   : > { %568 = vmatpush.bf16.msra.mxu1 %v559_v1 }
 0x215   : > { %v583_v2 = vpop.permute.xlu2 %582 }
 0x21d   : > { %v718_v3 = vpop.permute.xlu2 %717 }
 0x21e   : > { %1520 = vmatpush.xpose.msk.msrb.mxu1 %vm452_vm10, %v718_v3 }
 0x223   : > { %v516_v4 = vpop.permute.xlu0 %515 }
 0x224   : > { %1511 = vmatpush.xpose.msk.msra.mxu3 %vm452_vm10, %v516_v4 }
 0x228   : > { %1514 = vmatpush.xpose.msk.msrb.mxu3 %vm452_vm10, %v583_v2 }
 0x22b   : > { %v514_v5 = vpop.permute.xlu0 %513 }
 0x22c   : > { %1512 = vmatmul.msk.f32.vlgmr.msra.gmra.mxu3 %vm452_vm10, %v514_v5 }
 0x233   : > { %v581_v6 = vpop.permute.xlu0 %580 }
 0x234   : > { %1515 = vmatmul.msk.f32.vlgmr.msrb.gmra.mxu3 %vm452_vm10, %v581_v6 }
 0x23b   : > { %v648_v24 = vpop.permute.xlu0 %647 }
 0x2af   : > { %v538_v11 = vpop.f32.mrf.mxu3 }
 0x2b0   : > { %v539_v12 = vadd.f32 %v538_v11, %v1889_v10 }
 0x2b2   : > { %v541_v13 = vsel %vm452_vm10, %v539_v12, -inf }
 0x2b3   : > { %542 = vmax.xlane.f32.xlu1 %v541_v13 }
 0x2b7   : > { %v605_v29 = vpop.f32.mrf.mxu3 }
 0x2b8   : > { %v606_v49 = vadd.f32 %v605_v29, %v1889_v10 }
 0x2ba   : > { %v608_v50 = vsel %vm452_vm10, %v606_v49, -inf }
 0x326   : > { %v543_v14 = vpop.xlane.xlu1 %542 }
 0x327   : > { %v544_v15 = vsub.f32 %v539_v12, %v543_v14 }
 0x329   : > { %v545_v16 = vmul.f32 1.442695, %v544_v15 }
 0x32b   : > { %1643 = vpow2.f32 %v545_v16 }
 0x331   : > { %v1644_v17 = vpop.eup %1643 }
 0x332   : > { %v547_v18 = vsel %vm452_vm10, %v1644_v17, 0.0 }
 0x333   : > { %548 = vadd.xlane.f32.xlu1 %v547_v18 }
 0x34c   : > { %649 = vrot.lane.b32.xlu1 %v1857_v60, %s1743_s17 }
 0x354   : > { %450 = vrot.lane.b32.xlu1 %v1857_v60, %s1741_s11 }
 0x3a6   : > { %v549_v19 = vpop.xlane.xlu1 %548 }
 0x3a7   : > { %1645 = vrcp.f32 %v549_v19 }
 0x3ad   : > { %v1646_v20 = vpop.eup %1645 }
 0x3ae   : > { %v551_v21 = vmul.f32 %v1646_v20, %v1644_v17 }
 0x3b0   : > { %v552_v22 = vpack.c.bf16 %v551_v21, %v551_v21 }
 0x3b2   : > { %1513 = vmatmul.msk.bf16.vlgmr.msra.gmra.mxu1 %vm452_vm10, %v552_v22 }
 0x3be   : > { %v650_v23 = vpop.permute.xlu1 %649 }
 0x3bf   : > { %1517 = vmatpush.xpose.msk.msra.mxu3 %vm452_vm10, %v650_v23 }
 0x3c2   : > { %1518 = vmatmul.msk.f32.vlgmr.msra.gmra.mxu3 %vm452_vm10, %v648_v24  ;;  %1521 = vmatmul.msk.f32.vlgmr.msrb.gmra.mxu1 %vm452_vm10, %v1872_v63 }
 0x3c6   : > { %v451_v25 = vpop.permute.xlu1 %450 }
 0x3c7   : > { %1508 = vmatpush.xpose.msk.msrb.mxu0 %vm452_vm10, %v451_v25 }
 0x3ca   : > { %1509 = vmatmul.msk.f32.vlgmr.msrb.gmra.mxu0 %vm452_vm10, %v1857_v60 }
 0x42f   : > { %v1906_v26 = vpop.f32.mrf.mxu1 }
 0x437   : > { %v572_v27 = vpop.f32.mrf.mxu1 }
 0x43f   : > { %v740_v30 = vpop.f32.mrf.mxu1 }
 0x440   : > { %v741_v31 = vadd.f32 %v740_v30, %v1908_v28 }
 0x442   : > { %v743_v32 = vsel %vm452_vm10, %v741_v31, -inf }
 0x443   : > { %744 = vmax.xlane.f32.xlu2 %v743_v32 }
 0x445   : > { %v672_v33 = vpop.f32.mrf.mxu3 }
 0x446   : > { %v673_v34 = vadd.f32 %v672_v33, %v1889_v10 }
 0x447   : > { %v474_v51 = vpop.f32.mrf.mxu0 }
 0x448   : > { %v675_v35 = vsel %vm452_vm10, %v673_v34, -inf  ;;  %v475_v52 = vadd.f32 %v474_v51, %v1889_v10 }
 0x449   : > { %676 = vmax.xlane.f32.xlu0 %v675_v35 }
 0x44a   : > { %v477_v53 = vsel %vm452_vm10, %v475_v52, -inf }
 0x45d   : > { %687 = vrot.lane.b32.xlu0 %v1863_v61, %s1744_s19 }
 0x465   : > { %912 = vrot.lane.b32.xlu0 %v1872_v63, %s1743_s17 }
 0x46d   : > { %910 = vrot.lane.b32.xlu0 %v1872_v63, %s1742_s13 }
 0x475   : > { %844 = vrot.lane.b32.xlu0 %v1872_v63, %s1740_s10 }
 0x4b6   : > { %v745_v36 = vpop.xlane.xlu2 %744 }
 0x4b7   : > { %v746_v37 = vsub.f32 %v741_v31, %v745_v36 }
 0x4b9   : > { %v747_v38 = vmul.f32 1.442695, %v746_v37 }
 0x4bb   : > { %1647 = vpow2.f32 %v747_v38 }
 0x4bc   : > { %v677_v39 = vpop.xlane.xlu0 %676 }
 0x4bd   : > { %v678_v40 = vsub.f32 %v673_v34, %v677_v39 }
 0x4bf   : > { %v679_v41 = vmul.f32 1.442695, %v678_v40 }
 0x4c1   : > { %v1648_v42 = vpop.eup %1647  ;;  %1649 = vpow2.f32 %v679_v41 }
 0x4c2   : > { %v749_v43 = vsel %vm452_vm10, %v1648_v42, 0.0 }
 0x4c3   : > { %750 = vadd.xlane.f32.xlu1 %v749_v43 }
 0x4c7   : > { %v1650_v44 = vpop.eup %1649 }
 0x4c8   : > { %v681_v45 = vsel %vm452_vm10, %v1650_v44, 0.0 }
 0x4c9   : > { %682 = vadd.xlane.f32.xlu2 %v681_v45 }
 0x4cf   : > { %v688_v46 = vpop.permute.xlu0 %687 }
 0x4d0   : > { %v693_v47 = vsel %vm495_vm9, %v688_v46, 0 }
 0x4d1   : > { %702 = vmatpush.bf16.msra.mxu0 %v693_v47 }
 0x4d7   : > { %v913_v62 = vpop.permute.xlu0 %912 }
 0x4dc   : > { %780 = vrot.lane.b32.xlu1 %v1872_v63, %s1736_s26 }
 0x4df   : > { %v911_v6 = vpop.permute.xlu0 %910 }
 0x4e1   : > { %756 = vrot.lane.b32.xlu2 %v1929_v48, %s1745_s20 }
 0x4e7   : > { %v845_v9 = vpop.permute.xlu0 %844 }
 0x4e9   : > { %778 = vrot.lane.b32.xlu2 %v1872_v63, %s1738_s30 }
 0x4f1   : > { %846 = vrot.lane.b32.xlu2 %v1872_v63, %s1739_s9 }
 0x506   : > { %609 = vmax.xlane.f32.xlu1 %v608_v50 }
 0x51a   : > { %478 = vmax.xlane.f32.xlu2 %v477_v53 }
 0x536   : > { %v751_v54 = vpop.xlane.xlu1 %750 }
 0x537   : > { %1651 = vrcp.f32 %v751_v54 }
 0x53c   : > { %v683_v57 = vpop.xlane.xlu2 %682 }
 0x53d   : > { %1653 = vrcp.f32 %v683_v57  ;;  %v1652_v59 = vpop.eup %1651 }
 0x53e   : > { %v753_v0 = vmul.f32 %v1652_v59, %v1648_v42 }
 0x540   : > { %v754_v4 = vpack.c.bf16 %v753_v0, %v753_v0 }
 0x543   : > { %v1654_v60 = vpop.eup %1653 }
 0x544   : > { %v685_v63 = vmul.f32 %v1654_v60, %v1650_v44  ;;  %v757_v1 = vpop.permute.xlu2 %756 }
 0x545   : > { %v762_v2 = vsel %vm495_vm9, %v757_v1, 0 }
 0x546   : > { %v686_v3 = vpack.c.bf16 %v685_v63, %v685_v63  ;;  %771 = vmatpush.bf16.msrb.mxu3 %v762_v2 }
 0x548   : > { %1519 = vmatmul.msk.bf16.vlgmr.msra.gmra.mxu0 %vm452_vm10, %v686_v3 }
 0x549   : > { %1522 = vmatmul.msk.bf16.vlgmr.msrb.gmra.mxu3 %vm452_vm10, %v754_v4 }
 0x54a   : > { %1529 = vmatpush.xpose.msk.msra.mxu3 %vm452_vm10, %v913_v62 }
 0x54c   : > { %v779_v5 = vpop.permute.xlu2 %778 }
 0x54e   : > { %v781_v7 = vpop.permute.xlu1 %780 }
 0x54f   : > { %1523 = vmatpush.xpose.msk.msra.mxu1 %vm452_vm10, %v781_v7 }
 0x552   : > { %1524 = vmatmul.msk.f32.vlgmr.msra.gmra.mxu1 %vm452_vm10, %v779_v5 }
 0x554   : > { %v847_v8 = vpop.permute.xlu2 %846 }
 0x555   : > { %1526 = vmatpush.xpose.msk.msrb.mxu0 %vm452_vm10, %v847_v8 }
 0x558   : > { %1527 = vmatmul.msk.f32.vlgmr.msrb.gmra.mxu0 %vm452_vm10, %v845_v9 }
 0x559   : > { %1530 = vmatmul.msk.f32.vlgmr.msra.gmra.mxu3 %vm452_vm10, %v911_v6 }
 0x579   : > { %v610_v19 = vpop.xlane.xlu1 %609 }
 0x57a   : > { %v611_v22 = vsub.f32 %v606_v49, %v610_v19 }
 0x57c   : > { %v612_v27 = vmul.f32 1.442695, %v611_v22 }
 0x58d   : > { %v479_v11 = vpop.xlane.xlu2 %478 }
 0x58e   : > { %v480_v12 = vsub.f32 %v475_v52, %v479_v11 }
 0x590   : > { %v481_v14 = vmul.f32 1.442695, %v480_v12 }
 0x592   : > { %1655 = vpow2.f32 %v481_v14 }
 0x593   : > { %1657 = vpow2.f32 %v612_v27  ;;  %v1534_v27 = vld [vmem:[%s1814_s12] sm:$0xf] }
 0x598   : > { %v1656_v24 = vpop.eup %1655 }
 0x599   : > { %v483_v29 = vsel %vm452_vm10, %v1656_v24, 0.0  ;;  %v1658_v33 = vpop.eup %1657 }
 0x59a   : > { %v614_v34 = vsel %vm452_vm10, %v1658_v33, 0.0 }
 0x5c5   : > { %v1950_v10 = vpop.f32.mrf.mxu0 }
 0x5cc   : > { %v773_v13 = vpop.f32.mrf.mxu3 }
 0x5cd   : > { %777 = vst.msk [vmem:[#allocation3 + $0x8] sm:$0xff] %vm452_vm10, %v773_v13  ;;  %v706_v15 = vpop.f32.mrf.mxu0 }
 0x5cf   : > { %v803_v16 = vpop.f32.mrf.mxu1 }
 0x5d0   : > { %v804_v17 = vadd.f32 %v803_v16, %v1908_v28 }
 0x5d2   : > { %v806_v18 = vsel %vm452_vm10, %v804_v17, -inf }
 0x5d3   : > { %807 = vmax.xlane.f32.xlu0 %v806_v18 }
 0x5d4   : > { %v775_v20 = vpop.f32.mrf.mxu3 }
 0x5d5   : > { %v869_v21 = vpop.f32.mrf.mxu0 }
 0x5d6   : > { %v870_v23 = vadd.f32 %v869_v21, %v1908_v28 }
 0x5d8   : > { %v872_v25 = vsel %vm452_vm10, %v870_v23, -inf }
 0x5d9   : > { %873 = vmax.xlane.f32.xlu2 %v872_v25 }
 0x5db   : > { %484 = vadd.xlane.f32.xlu0 %v483_v29  ;;  %v1588_v29 = vld [vmem:[%s1814_s12 + $0x4] sm:$0xf0] }
 0x5dc   : > { %v935_v30 = vpop.f32.mrf.mxu3 }
 0x5dd   : > { %v936_v31 = vadd.f32 %v935_v30, %v1908_v28  ;;  %v1535_v30 = vor.u32 %v1588_v29, %v1534_v27 }
 0x5df   : > { %v938_v32 = vsel %vm452_vm10, %v936_v31, -inf }
 0x5e0   : > { %939 = vmax.xlane.f32.xlu1 %v938_v32 }
 0x5e8   : > { %615 = vadd.xlane.f32.xlu1 %v614_v34 }
 0x5ef   : > { %620 = vrot.lane.b32.xlu0 %v1863_v61, %s1746_s21 }
 0x5f1   : > { %490 = vrot.lane.b32.xlu2 %v1863_v61, %s1745_s20 }
 0x5f9   : > { %818 = vrot.lane.b32.xlu2 %v1929_v48, %s1737_s29  ;;  %s1752_s29 = smov (!%p1569_p5), 96  }
 0x601   : > { %950 = vrot.lane.b32.xlu2 %v1929_v48, %s1744_s19 }
 0x609   : > { %575 = vrot.lane.b32.xlu2 %v1906_v26, %s1747_s22 }
 0x646   : > { %v808_v28 = vpop.xlane.xlu0 %807 }
 0x647   : > { %v809_v35 = vsub.f32 %v804_v17, %v808_v28 }
 0x649   : > { %v810_v36 = vmul.f32 1.442695, %v809_v35 }
 0x64b   : > { %1659 = vpow2.f32 %v810_v36 }
 0x64c   : > { %v874_v37 = vpop.xlane.xlu2 %873 }
 0x64d   : > { %v875_v38 = vsub.f32 %v870_v23, %v874_v37  ;;  %v1538_v23 = vld [vmem:[%s1814_s12 + $0x10] sm:$0xf] }
 0x64e   : > { %v485_v39 = vpop.xlane.xlu0 %484 }
 0x64f   : > { %v876_v40 = vmul.f32 1.442695, %v875_v38  ;;  %1661 = vrcp.f32 %v485_v39 }
 0x651   : > { %v1660_v61 = vpop.eup %1659  ;;  %1663 = vpow2.f32 %v876_v40 }
 0x652   : > { %v812_v41 = vsel %vm452_vm10, %v1660_v61, 0.0 }
 0x653   : > { %v940_v42 = vpop.xlane.xlu1 %939  ;;  %813 = vadd.xlane.f32.xlu1 %v812_v41 }
 0x654   : > { %v941_v43 = vsub.f32 %v936_v31, %v940_v42  ;;  %v491_v44 = vpop.permute.xlu2 %490 }
 0x655   : > { %v1662_v45 = vpop.eup %1661  ;;  %v497_v26 = vsel %vm495_vm9, %v491_v44, 0 }
 0x656   : > { %v942_v46 = vmul.f32 1.442695, %v941_v43  ;;  %506 = vmatpush.bf16.msra.mxu2 %v497_v26  ;;  %v487_v47 = vmul.f32 %v1662_v45, %v1656_v24  ;;  %v1589_v24 = vld [vmem:[%s1814_s12 + $0x14] sm:$0xf0] }
 0x657   : > { %v1664_v49 = vpop.eup %1663  ;;  %v1539_v25 = vor.u32 %v1589_v24, %v1538_v23 }
 0x658   : > { %1665 = vpow2.f32 %v942_v46  ;;  %v488_v50 = vpack.c.bf16 %v487_v47, %v487_v47  ;;  %v878_v51 = vsel %vm452_vm10, %v1664_v49, 0.0 }
 0x65a   : > { %1510 = vmatmul.msk.bf16.vlgmr.msra.gmra.mxu2 %vm452_vm10, %v488_v50 }
 0x65b   : > { %v616_v52 = vpop.xlane.xlu1 %615  ;;  %879 = vadd.xlane.f32.xlu1 %v878_v51 }
 0x65c   : > { %1667 = vrcp.f32 %v616_v52  ;;  %v819_v53 = vpop.permute.xlu2 %818  ;;  %v1751_v52 = vmov 32.0  }
 0x65d   : > { %v824_v0 = vsel %vm495_vm9, %v819_v53, 0 }
 0x65e   : > { %v1666_v54 = vpop.eup %1665 }
 0x65f   : > { %v944_v57 = vsel %vm452_vm10, %v1666_v54, 0.0 }
 0x660   : > { %945 = vadd.xlane.f32.xlu0 %v944_v57  ;;  %v1641_v57 = vld [vmem:[%s1824_s18 + $0x1] ss:$0 sm:$0xff] }
 0x661   : > { %v621_v59 = vpop.permute.xlu0 %620 }
 0x662   : > { %v1668_v60 = vpop.eup %1667  ;;  %v626_v62 = vsel %vm495_vm9, %v621_v59, 0 }
 0x663   : > { %635 = vmatpush.bf16.msrb.mxu2 %v626_v62  ;;  %v618_v63 = vmul.f32 %v1668_v60, %v1658_v33 }
 0x664   : > { %v951_v1 = vpop.permute.xlu2 %950 }
 0x665   : > { %v956_v2 = vsel %vm495_vm9, %v951_v1, 0  ;;  %v619_v3 = vpack.c.bf16 %v618_v63, %v618_v63 }
 0x666   : > { %965 = vmatpush.bf16.msra.mxu0 %v956_v2 }
 0x667   : > { %833 = vmatpush.bf16.msra.mxu2 %v824_v0 }
 0x66a   : > { %1516 = vmatmul.msk.bf16.vlgmr.msrb.gmra.mxu2 %vm452_vm10, %v619_v3 }
 0x66c   : > { %v576_v15 = vpop.permute.xlu2 %575 }
 0x674   : > { %884 = vrot.lane.b32.xlu1 %v1929_v48, %s1746_s21  ;;  %995 = vrot.lane.b32.xlu0 %v1539_v25, %s1750_s25 }
 0x6c6   : > { %v814_v4 = vpop.xlane.xlu1 %813 }
 0x6c7   : > { %1669 = vrcp.f32 %v814_v4 }
 0x6cd   : > { %v1670_v5 = vpop.eup %1669 }
 0x6ce   : > { %v816_v6 = vmul.f32 %v1670_v5, %v1660_v61  ;;  %v880_v9 = vpop.xlane.xlu1 %879 }
 0x6d0   : > { %v817_v7 = vpack.c.bf16 %v816_v6, %v816_v6 }
 0x6d2   : > { %1525 = vmatmul.msk.bf16.vlgmr.msra.gmra.mxu2 %vm452_vm10, %v817_v7 }
 0x6d3   : > { %v946_v8 = vpop.xlane.xlu0 %945 }
 0x6d4   : > { %1671 = vrcp.f32 %v946_v8  ;;  %v1547_v8 = vld [vmem:[%s1814_s12 + $0x14] sm:$0xf] }
 0x6d5   : > { %1673 = vrcp.f32 %v880_v9  ;;  %v1591_v9 = vld [vmem:[%s1814_s12 + $0x18] sm:$0xf0] }
 0x6d6   : > { %1675 = vrcp.f32 %v1751_v52 }
 0x6da   : > { %v1672_v11 = vpop.eup %1671 }
 0x6db   : > { %v948_v12 = vmul.f32 %v1672_v11, %v1666_v54  ;;  %v1674_v48 = vpop.eup %1673  ;;  %v1548_v11 = vor.u32 %v1591_v9, %v1547_v8 }
 0x6dc   : > { %v882_v16 = vmul.f32 %v1674_v48, %v1664_v49  ;;  %v1676_v53 = vpop.eup %1675 }
 0x6dd   : > { %v949_v13 = vpack.c.bf16 %v948_v12, %v948_v12  ;;  %v508_v14 = vpop.f32.mrf.mxu2  ;;  %v1028_v54 = vmul.f32 32.0, %v1676_v53  ;;  %vm1032_vm14 = vweird.f32 %v1676_v53  ;;  %1111 = vmatpush.bf16.msrb.mxu3 %v1548_v11 }
 0x6de   : > { %512 = vst.msk [vmem:[#allocation3] sm:$0xff] %vm452_vm10, %v508_v14  ;;  %v883_v20 = vpack.c.bf16 %v882_v16, %v882_v16  ;;  %v1543_v14 = vld [vmem:[%s1814_s12 + $0x4] sm:$0xf] }
 0x6df   : > { %579 = vst.msk [vmem:[#allocation3] sm:$0xff] %vm578_vm11, %v576_v15  ;;  %1531 = vmatmul.msk.bf16.vlgmr.msra.gmra.mxu0 %vm452_vm10, %v949_v13  ;;  %v1029_v59 = vsub.f32 1.0, %v1028_v54  ;;  %v1590_v15 = vld [vmem:[%s1814_s12 + $0x8] sm:$0xf0] }
 0x6e0   : > { %v1544_v48 = vor.u32 %v1590_v15, %v1543_v14  ;;  %v1593_v15 = vld [vmem:[%s1819_s15 + $0x8] sm:$0xff] }
 0x6e1   : > { %v1030_v60 = vmul.f32 %v1676_v53, %v1029_v59 }
 0x6e2   : > { %1112 = vmatpush.bf16.msrb.mxu3 %v1544_v48 }
 0x6e5   : > { %v510_v17 = vpop.f32.mrf.mxu2 }
 0x6e6   : > { %v885_v18 = vpop.permute.xlu1 %884  ;;  %v996_v37 = vpop.permute.xlu0 %995 }
 0x6e7   : > { %v890_v19 = vsel %vm495_vm9, %v885_v18, 0  ;;  %1011 = vmatpush.bf16.msrb.mxu2 %v996_v37 }
 0x6e8   : > { %899 = vmatpush.bf16.msrb.mxu1 %v890_v19 }
 0x6eb   : > { %1528 = vmatmul.msk.bf16.vlgmr.msrb.gmra.mxu1 %vm452_vm10, %v883_v20 }
 0x6ed   : > { %v637_v21 = vpop.f32.mrf.mxu2 }
 0x6ee   : > { %642 = vrot.lane.b32.xlu1 %v637_v21, %s1748_s23 }
 0x6f5   : > { %v639_v22 = vpop.f32.mrf.mxu2 }
 0x6f6   : > { %709 = vrot.lane.b32.xlu1 %v1950_v10, %s1749_s24 }
 0x6fe   : > { %993 = vrot.lane.b32.xlu1 %v1535_v30, %s1750_s25 }
 0x755   : > { %v835_v31 = vpop.f32.mrf.mxu2 }
 0x756   : > { %840 = vrot.lane.b32.xlu2 %v835_v31, %s1747_s22 }
 0x75c   : > { %v967_v32 = vpop.f32.mrf.mxu0 }
 0x75d   : > { %v837_v33 = vpop.f32.mrf.mxu2 }
 0x760   : > { %v643_v34 = vpop.permute.xlu1 %642 }
 0x761   : > { %646 = vst.msk [vmem:[#allocation3] sm:$0xff] %vm645_vm12, %v643_v34 }
 0x764   : > { %v969_v28 = vpop.f32.mrf.mxu0 }
 0x768   : > { %v901_v10 = vpop.f32.mrf.mxu1  ;;  %v710_v35 = vpop.permute.xlu1 %709 }
 0x769   : > { %713 = vst.msk [vmem:[#allocation3] sm:$0xff] %vm712_vm13, %v710_v35  ;;  %906 = vrot.lane.b32.xlu2 %v901_v10, %s1748_s23 }
 0x770   : > { %v903_v36 = vpop.f32.mrf.mxu1  ;;  %v994_v39 = vpop.permute.xlu1 %993  ;;  %v976_v41 = vld [vmem:[#allocation3] sm:$0xff] }
 0x771   : > { %972 = vrot.lane.b32.xlu2 %v967_v32, %s1749_s24  ;;  %1012 = vmatpush.bf16.msrb.mxu2 %v994_v39 }
 0x779   : > { %999 = vrot.lane.b32.xlu2 %v1854_v58, %s1750_s25 }
 0x7b0   : > { %v841_v38 = vpop.permute.xlu2 %840 }
 0x7b1   : > { %843 = vst.msk [vmem:[#allocation3 + $0x8] sm:$0xff] %vm578_vm11, %v841_v38 }
 0x7c3   : > { %v907_v40 = vpop.permute.xlu2 %906 }
 0x7c4   : > { %909 = vst.msk [vmem:[#allocation3 + $0x8] sm:$0xff] %vm645_vm12, %v907_v40 }
 0x7cb   : > { %v973_v61 = vpop.permute.xlu2 %972 }
 0x7cc   : > { %975 = vst.msk [vmem:[#allocation3 + $0x8] sm:$0xff] %vm712_vm13, %v973_v61 }
 0x7d3   : > { %v977_v42 = vld [vmem:[#allocation3 + $0x8] sm:$0xff]  ;;  %v1000_v58 = vpop.permute.xlu2 %999 }
 0x7d4   : > { %v978_v43 = vpack.c.bf16 %v977_v42, %v976_v41 }
 0x7d6   : > { %1540 = vmatmul.msk.bf16.vlgmr.msrb.gmra.mxu2 %vm426_vm8, %v978_v43 }
 0x859   : > { %v1014_v44 = vpop.f32.mrf.mxu2 }
 0x85a   : > { %v1015_v45 = vadd.f32 %v1014_v44, %v1000_v58 }
 0x85c   : > { %v1019_v26 = vadd.f32 %v1015_v45, %v1846_v55  ;;  %v1031_v55 = vadd.f32 %v1676_v53, %v1030_v60 }
 0x85e   : > { %v1021_v46 = vsel %vm426_vm8, %v1019_v26, 0.0  ;;  %v2007_v62 = vsel %vm1032_vm14, %v1676_v53, %v1031_v55  ;;  %vm1243_vm14 = vcmask 523264  }
 0x85f   : > { %1022 = vadd.xlane.f32.xlu1 %v1021_v46 }
 0x861   : > { %v1016_v47 = vpop.f32.mrf.mxu2 }
 0x862   : > { %v1017_v49 = vadd.f32 %v1016_v47, %v1000_v58 }
 0x864   : > { %v1020_v50 = vadd.f32 %v1017_v49, %v1848_v56 }
 0x866   : > { %v1024_v51 = vsel %vm426_vm8, %v1020_v50, 0.0 }
 0x867   : > { %1025 = vadd.xlane.f32.xlu2 %v1024_v51 }
 0x87f   : > { %1077 = vrot.lane.b32.xlu2 %v1641_v57, %s1741_s11 }
 0x8d2   : > { %v1023_v0 = vpop.xlane.xlu1 %1022 }
 0x8d3   : > { %v1034_v56 = vmul.f32 %v2007_v62, %v1023_v0  ;;  %v1595_v0 = vld [vmem:[%s1819_s15 + $0x18] sm:$0xff] }
 0x8d4   : > { %1251 = vmatpush.bf16.msra.mxu1 %v1595_v0 }
 0x8d5   : > { %v1036_v63 = vsub.f32 %v1019_v26, %v1034_v56 }
 0x8d7   : > { %v1038_v1 = vmul.f32 %v1036_v63, %v1036_v63 }
 0x8d9   : > { %v1040_v2 = vsel %vm426_vm8, %v1038_v1, 0.0 }
 0x8da   : > { %v1026_v3 = vpop.xlane.xlu2 %1025  ;;  %1041 = vadd.xlane.f32.xlu0 %v1040_v2 }
 0x8db   : > { %v1035_v4 = vmul.f32 %v2007_v62, %v1026_v3 }
 0x8dd   : > { %v1037_v5 = vsub.f32 %v1020_v50, %v1035_v4 }
 0x8df   : > { %v1039_v6 = vmul.f32 %v1037_v5, %v1037_v5 }
 0x8e1   : > { %v1043_v7 = vsel %vm426_vm8, %v1039_v6, 0.0  ;;  %v1594_v6 = vld [vmem:[%s1819_s15 + $0x10] sm:$0xff] }
 0x8e2   : > { %1044 = vadd.xlane.f32.xlu1 %v1043_v7  ;;  %v1078_v37 = vpop.permute.xlu2 %1077  ;;  %1252 = vmatpush.bf16.msra.mxu1 %v1594_v6 }
 0x8e6   : > { %1253 = vmatpush.bf16.msra.mxu1 %v1593_v15 }
 0x8fb   : > { %1099 = vrot.lane.b32.xlu1 %v1641_v57, %s1745_s20 }
 0x94d   : > { %v1042_v12 = vpop.xlane.xlu0 %1041 }
 0x94e   : > { %v1046_v13 = vmul.f32 %v1042_v12, %v2007_v62 }
 0x950   : > { %v1048_v16 = vadd.f32 1e-05, %v1046_v13 }
 0x952   : > { %1677 = vrsqrt.f32 %v1048_v16  ;;  %vm1056_vm0 = vweird.f32 %v1048_v16 }
 0x955   : > { %v1045_v17 = vpop.xlane.xlu1 %1044 }
 0x956   : > { %v1047_v18 = vmul.f32 %v1045_v17, %v2007_v62 }
 0x958   : > { %v1678_v19 = vpop.eup %1677  ;;  %v1049_v20 = vadd.f32 1e-05, %v1047_v18 }
 0x959   : > { %v1051_v21 = vmul.f32 %v1678_v19, %v1048_v16  ;;  %vm1057_vm15 = vweird.f32 %v1678_v19 }
 0x95a   : > { %1679 = vrsqrt.f32 %v1049_v20  ;;  %vm1058_vm1 = vmor %vm1056_vm0, %vm1057_vm15  ;;  %vm1066_vm3 = vweird.f32 %v1049_v20 }
 0x95b   : > { %v1052_v22 = vmul.f32 %v1678_v19, %v1051_v21 }
 0x95d   : > { %v1053_v23 = vmul.f32 0.5, %v1052_v22 }
 0x95f   : > { %v1054_v24 = vsub.f32 1.5, %v1053_v23 }
 0x960   : > { %v1680_v25 = vpop.eup %1679 }
 0x961   : > { %v1055_v27 = vmul.f32 %v1678_v19, %v1054_v24  ;;  %v1061_v29 = vmul.f32 %v1680_v25, %v1049_v20  ;;  %vm1067_vm2 = vweird.f32 %v1680_v25  ;;  %v1592_v20 = vld [vmem:[%s1819_s15] sm:$0xff] }
 0x962   : > { %vm1068_vm4 = vmor %vm1066_vm3, %vm1067_vm2  ;;  %1254 = vmatpush.bf16.msra.mxu1 %v1592_v20 }
 0x963   : > { %v1062_v30 = vmul.f32 %v1680_v25, %v1061_v29  ;;  %v1059_v32 = vsel %vm1058_vm1, %v1678_v19, %v1055_v27 }
 0x964   : > { %v1070_v34 = vmul.f32 %v1059_v32, %v1036_v63 }
 0x965   : > { %v1063_v31 = vmul.f32 0.5, %v1062_v30 }
 0x966   : > { %v1075_v36 = vmul.f32 %v1641_v57, %v1070_v34 }
 0x967   : > { %v1064_v33 = vsub.f32 1.5, %v1063_v31 }
 0x968   : > { %v2020_v39 = vadd.f32 %v1078_v37, %v1075_v36 }
 0x969   : > { %v1065_v28 = vmul.f32 %v1680_v25, %v1064_v33 }
 0x96b   : > { %v1069_v10 = vsel %vm1068_vm4, %v1680_v25, %v1065_v28  ;;  %v2046_v25 = vld [vmem:[%s1824_s18 + $0x2] ss:$0 sm:$0xff] }
 0x96c   : > { %v1071_v35 = vmul.f32 %v1069_v10, %v1037_v5  ;;  %1307 = vrot.lane.b32.xlu1 %v2046_v25, %s1741_s11 }
 0x96d   : > { %v1100_v41 = vpop.permute.xlu1 %1099 }
 0x96e   : > { %v1076_v38 = vmul.f32 %v1641_v57, %v1071_v35 }
 0x970   : > { %v2022_v40 = vadd.f32 %v1078_v37, %v1076_v38 }
 0x972   : > { %v1082_v61 = vpack.c.bf16 %v2022_v40, %v2020_v39 }
 0x974   : > { %1549 = vmatmul.msk.bf16.vlgmr.msrb.gmra.mxu3 %vm426_vm8, %v1082_v61 }
 0x9f7   : > { %v1114_v42 = vpop.f32.mrf.mxu3 }
 0x9f8   : > { %v2027_v43 = vadd.f32 %v1114_v42, %v1100_v41 }
 0x9fa   : > { %v2030_v58 = vmul.f32 0.70710677, %v2027_v43 }
 0x9fc   : > { %v1123_v44 = vmul.f32 %v2030_v58, %v2030_v58 }
 0x9fe   : > { %v1124_v45 = vmin.f32 %v1123_v44, 16.0 }
 0x9ff   : > { %v1116_v26 = vpop.f32.mrf.mxu3 }
 0xa00   : > { %v1125_v46 = vmul.f32 2.1237322e-06, %v1124_v45  ;;  %v1136_v47 = vmul.f32 3.8918573e-05, %v1124_v45  ;;  %v2034_v49 = vadd.f32 %v1116_v26, %v1100_v41 }
 0xa02   : > { %v1126_v50 = vadd.f32 0.00028619796, %v1125_v46  ;;  %v1137_v51 = vadd.f32 0.001143296, %v1136_v47  ;;  %v2037_v52 = vmul.f32 0.70710677, %v2034_v49 }
 0xa04   : > { %v1138_v53 = vmul.f32 %v1137_v51, %v1124_v45  ;;  %v1163_v54 = vmul.f32 %v2037_v52, %v2037_v52  ;;  %v1127_v57 = vmul.f32 %v1126_v50, %v1124_v45 }
 0xa06   : > { %v1139_v59 = vadd.f32 0.014752088, %v1138_v53  ;;  %v1164_v60 = vmin.f32 %v1163_v54, 16.0  ;;  %v1128_v1 = vadd.f32 0.0036580483, %v1127_v57 }
 0xa08   : > { %v1140_v55 = vmul.f32 %v1139_v59, %v1124_v45  ;;  %v1165_v56 = vmul.f32 2.1237322e-06, %v1164_v60  ;;  %v1176_v63 = vmul.f32 3.8918573e-05, %v1164_v60  ;;  %v1129_v9 = vmul.f32 %v1128_v1, %v1124_v45 }
 0xa0a   : > { %v1141_v2 = vadd.f32 0.112945676, %v1140_v55  ;;  %v1166_v3 = vadd.f32 0.00028619796, %v1165_v56  ;;  %v1177_v4 = vadd.f32 0.001143296, %v1176_v63 }
 0xa0b   : > { %v1130_v16 = vadd.f32 0.05243302, %v1129_v9 }
 0xa0c   : > { %v1142_v5 = vmul.f32 %v1141_v2, %v1124_v45  ;;  %v1167_v7 = vmul.f32 %v1166_v3, %v1164_v60  ;;  %v1178_v8 = vmul.f32 %v1177_v4, %v1164_v60  ;;  %v1119_v4 = vmul.f32 0.5, %v2027_v43 }
 0xa0d   : > { %v1131_v22 = vmul.f32 %v1130_v16, %v1124_v45 }
 0xa0e   : > { %v1143_v11 = vadd.f32 0.4994258, %v1142_v5  ;;  %v1168_v12 = vadd.f32 0.0036580483, %v1167_v7  ;;  %v1179_v13 = vadd.f32 0.014752088, %v1178_v8 }
 0xa0f   : > { %v1132_v30 = vadd.f32 0.18741608, %v1131_v22  ;;  %v1120_v5 = vmul.f32 0.5, %v2034_v49 }
 0xa10   : > { %v1144_v14 = vmul.f32 %v1143_v11, %v1124_v45  ;;  %v1180_v48 = vmul.f32 %v1179_v13, %v1164_v60  ;;  %v1169_v18 = vmul.f32 %v1168_v12, %v1164_v60 }
 0xa11   : > { %v1133_v28 = vmul.f32 %v1132_v30, %v1124_v45 }
 0xa12   : > { %v1145_v17 = vadd.f32 1.0, %v1144_v14  ;;  %v1181_v19 = vadd.f32 0.112945676, %v1180_v48  ;;  %v1170_v23 = vadd.f32 0.05243302, %v1169_v18 }
 0xa13   : > { %v1134_v61 = vadd.f32 1.1283791, %v1133_v28 }
 0xa14   : > { %1681 = vrcp.f32 %v1145_v17  ;;  %v1182_v21 = vmul.f32 %v1181_v19, %v1164_v60  ;;  %v1171_v32 = vmul.f32 %v1170_v23, %v1164_v60  ;;  %v1157_v35 = vand.u32 2147483648, %v1145_v17 }
 0xa15   : > { %v1155_v37 = vand.u32 2147483647, %v1145_v17  ;;  %vm1151_vm6 = vweird.f32 %v1145_v17  ;;  %v1135_v50 = vmul.f32 %v1134_v61, %v2030_v58  ;;  %v1308_v61 = vpop.permute.xlu1 %1307 }
 0xa16   : > { %v1183_v24 = vadd.f32 0.4994258, %v1182_v21  ;;  %v1172_v36 = vadd.f32 0.18741608, %v1171_v32  ;;  %v1158_v44 = vor.u32 1.1754944e-38, %v1157_v35 }
 0xa17   : > { %vm1156_vm9 = vcmp.eq.f32.partialorder %v1155_v37, 8.507059e+37 }
 0xa18   : > { %v1184_v27 = vmul.f32 %v1183_v24, %v1164_v60  ;;  %v1173_v26 = vmul.f32 %v1172_v36, %v1164_v60 }
 0xa1a   : > { %v1682_v29 = vpop.eup %1681  ;;  %v1185_v33 = vadd.f32 1.0, %v1184_v27  ;;  %v1174_v45 = vadd.f32 1.1283791, %v1173_v26 }
 0xa1b   : > { %v1147_v31 = vmul.f32 %v1682_v29, %v1145_v17  ;;  %vm1152_vm5 = vweird.f32 %v1682_v29 }
 0xa1c   : > { %1683 = vrcp.f32 %v1185_v33  ;;  %vm1153_vm7 = vmor %vm1151_vm6, %vm1152_vm5  ;;  %v1197_v53 = vand.u32 2147483648, %v1185_v33  ;;  %v1195_v59 = vand.u32 2147483647, %v1185_v33  ;;  %vm1191_vm11 = vweird.f32 %v1185_v33 }
 0xa1d   : > { %v1148_v34 = vsub.f32 1.0, %v1147_v31  ;;  %v1175_v63 = vmul.f32 %v1174_v45, %v2037_v52 }
 0xa1e   : > { %v1198_v0 = vor.u32 1.1754944e-38, %v1197_v53  ;;  %vm1196_vm13 = vcmp.eq.f32.partialorder %v1195_v59, 8.507059e+37 }
 0xa1f   : > { %v1149_v10 = vmul.f32 %v1682_v29, %v1148_v34 }
 0xa21   : > { %v1150_v38 = vadd.f32 %v1682_v29, %v1149_v10 }
 0xa22   : > { %v1684_v41 = vpop.eup %1683 }
 0xa23   : > { %v1154_v42 = vsel %vm1153_vm7, %v1682_v29, %v1150_v38  ;;  %v1187_v46 = vmul.f32 %v1684_v41, %v1185_v33  ;;  %vm1192_vm10 = vweird.f32 %v1684_v41 }
 0xa24   : > { %v1159_v47 = vsel %vm1156_vm9, %v1158_v44, %v1154_v42  ;;  %vm1193_vm12 = vmor %vm1191_vm11, %vm1192_vm10 }
 0xa25   : > { %v1188_v51 = vsub.f32 1.0, %v1187_v46  ;;  %v1160_v54 = vmul.f32 %v1159_v47, %v1135_v50 }
 0xa27   : > { %v1189_v57 = vmul.f32 %v1684_v41, %v1188_v51  ;;  %v1550_v56 = vclamps-f32 %v1160_v54, 1.0 }
 0xa29   : > { %v1190_v55 = vadd.f32 %v1684_v41, %v1189_v57  ;;  %v1203_v3 = vadd.f32 1.0, %v1550_v56 }
 0xa2b   : > { %v1194_v60 = vsel %vm1193_vm12, %v1684_v41, %v1190_v55  ;;  %v1205_v7 = vmul.f32 %v1203_v3, %v1119_v4 }
 0xa2c   : > { %v1199_v1 = vsel %vm1196_vm13, %v1198_v0, %v1194_v60 }
 0xa2d   : > { %v1200_v2 = vmul.f32 %v1199_v1, %v1175_v63 }
 0xa2f   : > { %v1551_v58 = vclamps-f32 %v1200_v2, 1.0 }
 0xa31   : > { %v1204_v6 = vadd.f32 1.0, %v1551_v58 }
 0xa33   : > { %v1206_v8 = vmul.f32 %v1204_v6, %v1120_v5 }
 0xa35   : > { %v1207_v9 = vpack.c.bf16 %v1206_v8, %v1205_v7 }
 0xa37   : > { %1568 = vmatmul.msk.bf16.vlgmr.msra.gmra.mxu1 %vm1243_vm14, %v1207_v9 }
 0xab4   : > { %v1256_v11 = vpop.f32.mrf.mxu1 }
 0xab5   : > { %v1257_v12 = vadd.f32 %v2046_v25, %v1256_v11 }
 0xab7   : > { %v1261_v52 = vadd.f32 %v1257_v12, %v2020_v39 }
 0xab9   : > { %v1263_v13 = vsel %vm426_vm8, %v1261_v52, 0.0 }
 0xaba   : > { %1264 = vadd.xlane.f32.xlu0 %v1263_v13 }
 0xabc   : > { %v1258_v14 = vpop.f32.mrf.mxu1 }
 0xabd   : > { %v1259_v15 = vadd.f32 %v2046_v25, %v1258_v14 }
 0xabf   : > { %v1262_v43 = vadd.f32 %v1259_v15, %v2022_v40 }
 0xac1   : > { %v1266_v49 = vsel %vm426_vm8, %v1262_v43, 0.0 }
 0xac2   : > { %1267 = vadd.xlane.f32.xlu0 %v1266_v49 }
 0xb2d   : > { %v1265_v48 = vpop.xlane.xlu0 %1264 }
 0xb2e   : > { %v1269_v16 = vmul.f32 %v1265_v48, %v2007_v62 }
 0xb30   : > { %v1271_v17 = vsub.f32 %v1261_v52, %v1269_v16 }
 0xb32   : > { %v1273_v18 = vmul.f32 %v1271_v17, %v1271_v17 }
 0xb34   : > { %v1275_v19 = vsel %vm426_vm8, %v1273_v18, 0.0 }
 0xb35   : > { %1276 = vadd.xlane.f32.xlu2 %v1275_v19  ;;  %v1268_v39 = vpop.xlane.xlu0 %1267 }
 0xb36   : > { %v1270_v20 = vmul.f32 %v1268_v39, %v2007_v62 }
 0xb38   : > { %v1272_v21 = vsub.f32 %v1262_v43, %v1270_v20 }
 0xb3a   : > { %v1274_v22 = vmul.f32 %v1272_v21, %v1272_v21 }
 0xb3c   : > { %v1278_v23 = vsel %vm426_vm8, %v1274_v22, 0.0 }
 0xb3d   : > { %1279 = vadd.xlane.f32.xlu0 %v1278_v23 }
 0xb51   : > { %1312 = vrot.lane.b32.xlu0 %v2046_v25, %s1745_s20 }
 0xba8   : > { %v1277_v40 = vpop.xlane.xlu2 %1276 }
 0xba9   : > { %v1281_v24 = vmul.f32 %v1277_v40, %v2007_v62 }
 0xbab   : > { %v1283_v27 = vadd.f32 1e-05, %v1281_v24 }
 0xbad   : > { %1685 = vrsqrt.f32 %v1283_v27  ;;  %vm1291_vm0 = vweird.f32 %v1283_v27 }
 0xbb0   : > { %v1280_v29 = vpop.xlane.xlu0 %1279 }
 0xbb1   : > { %v1282_v30 = vmul.f32 %v1280_v29, %v2007_v62 }
 0xbb3   : > { %v1686_v31 = vpop.eup %1685  ;;  %v1284_v32 = vadd.f32 1e-05, %v1282_v30 }
 0xbb4   : > { %v1286_v33 = vmul.f32 %v1686_v31, %v1283_v27  ;;  %vm1292_vm15 = vweird.f32 %v1686_v31 }
 0xbb5   : > { %1687 = vrsqrt.f32 %v1284_v32  ;;  %vm1293_vm1 = vmor %vm1291_vm0, %vm1292_vm15  ;;  %vm1301_vm3 = vweird.f32 %v1284_v32 }
 0xbb6   : > { %v1287_v34 = vmul.f32 %v1686_v31, %v1286_v33 }
 0xbb8   : > { %v1288_v28 = vmul.f32 0.5, %v1287_v34 }
 0xbba   : > { %v1289_v10 = vsub.f32 1.5, %v1288_v28 }
 0xbbb   : > { %v1688_v35 = vpop.eup %1687 }
 0xbbc   : > { %v1296_v36 = vmul.f32 %v1688_v35, %v1284_v32  ;;  %v1290_v25 = vmul.f32 %v1686_v31, %v1289_v10  ;;  %vm1302_vm2 = vweird.f32 %v1688_v35 }
 0xbbd   : > { %vm1303_vm4 = vmor %vm1301_vm3, %vm1302_vm2 }
 0xbbe   : > { %v1297_v37 = vmul.f32 %v1688_v35, %v1296_v36  ;;  %v1294_v38 = vsel %vm1293_vm1, %v1686_v31, %v1290_v25 }
 0xbbf   : > { %v1305_v41 = vmul.f32 %v1294_v38, %v1271_v17 }
 0xbc0   : > { %v1298_v42 = vmul.f32 0.5, %v1297_v37 }
 0xbc1   : > { %v1310_v44 = vmul.f32 %v1308_v61, %v1305_v41 }
 0xbc2   : > { %v1299_v62 = vsub.f32 1.5, %v1298_v42 }
 0xbc3   : > { %v1313_v26 = vpop.permute.xlu0 %1312 }
 0xbc4   : > { %v1300_v46 = vmul.f32 %v1688_v35, %v1299_v62  ;;  %v1315_v47 = vadd.f32 %v1313_v26, %v1310_v44 }
 0xbc6   : > { %v1304_v50 = vsel %vm1303_vm4, %v1688_v35, %v1300_v46  ;;  %1317 = vst.msk [vmem:[#allocation2] sm:$0xff] %vm426_vm8, %v1315_v47 }
 0xbc7   : > { %v1306_v51 = vmul.f32 %v1304_v50, %v1272_v21 }
 0xbc9   : > { %v1311_v45 = vmul.f32 %v1308_v61, %v1306_v51  ;;  %1322 = sbr.rel (%p1569_p5) target bundleno = 3555 (0xde3), region = 60 }
 0xbcb   : > { %v1316_v53 = vadd.f32 %v1313_v26, %v1311_v45 }
 0xbcd   : > { %1318 = vst.msk [vmem:[#allocation2 + $0x8] sm:$0xff] %vm426_vm8, %v1316_v53 }
 0xbce   : > { %v1597_v54 = vld [vmem:[%s2098_s6 + $0x8] sm:$0xff]  ;;  %v1324_v57 = vrot.slane %v1316_v53, 7  ;;  %vm1326_vm5 = vcmask 1040384   ;;  %v1596_v59 = vld [vmem:[%s2098_s6] sm:$0xff]  ;;  %vm1392_vm6 = vcmask 9216  }
 0xbcf   : > { %1358 = vmatpush.bf16.msra.mxu0 %v1597_v54  ;;  %1369 = vrot.lane.b32.xlu0 %v1597_v54, %s1752_s29  ;;  %v1689_v56 = vld [vmem:[%s2099_s7] ss:$0 sm:$0xff] }
 0xbd0   : > { %v1327_v55 = vsel %vm1326_vm5, %v1315_v47, %v1324_v57  ;;  %1373 = vrot.lane.b32.xlu1 %v1689_v56, %s1752_s29 }
 0xbd1   : > { %v1328_v0 = vpack.c.bf16 %v1327_v55, %v1327_v55 }
 0xbd3   : > { %1359 = vmatpush.bf16.msra.mxu0 %v1596_v59 }
 0xbd6   : > { %1578 = vmatmul.msk.bf16.vlgmr.msra.gmra.mxu0 %vm426_vm8, %v1328_v0 }
 0xbd7   : > { %1367 = vrot.lane.b32.xlu0 %v1596_v59, %s1752_s29 }
 0xc41   : > { %v1370_v63 = vpop.permute.xlu0 %1369 }
 0xc42   : > { %1385 = vmatpush.bf16.msra.mxu1 %v1370_v63  ;;  %v1374_v5 = vpop.permute.xlu1 %1373 }
 0xc49   : > { %v1368_v60 = vpop.permute.xlu0 %1367 }
 0xc4a   : > { %1386 = vmatpush.bf16.msra.mxu1 %v1368_v60 }
 0xc53   : > { %v1361_v1 = vpop.f32.mrf.mxu0 }
 0xc54   : > { %v1362_v2 = vadd.f32 %v1689_v56, %v1361_v1 }
 0xc56   : > { %v1365_v3 = vmax.f32 %v1362_v2, 0.0 }
 0xc58   : > { %v1366_v58 = vpack.c.bf16 %v1365_v3, %v1365_v3 }
 0xc5a   : > { %1579 = vmatmul.msk.bf16.vlgmr.msra.gmra.mxu1 %vm426_vm8, %v1366_v58 }
 0xc5b   : > { %v1363_v4 = vpop.f32.mrf.mxu0 }
 0xcd7   : > { %v1388_v6 = vpop.f32.mrf.mxu1 }
 0xcd8   : > { %v1389_v7 = vadd.f32 %v1388_v6, %v1374_v5 }
 0xcda   : > { %v1393_v8 = vsel %vm1392_vm6, %v1389_v7, -inf }
 0xcdb   : > { %1394 = vmax.xlane.f32.xlu1 %v1393_v8 }
 0xcdf   : > { %v1390_v9 = vpop.f32.mrf.mxu1 }
 0xd4e   : > { %v1395_v11 = vpop.xlane.xlu1 %1394 }
 0xd4f   : > { %v1396_v12 = vsub.f32 %v1389_v7, %v1395_v11 }
 0xd51   : > { %v1397_v52 = vmul.f32 1.442695, %v1396_v12 }
 0xd53   : > { %1690 = vpow2.f32 %v1397_v52 }
 0xd59   : > { %v1691_v13 = vpop.eup %1690 }
 0xd5a   : > { %v1399_v14 = vsel %vm1392_vm6, %v1691_v13, 0.0 }
 0xd5b   : > { %1400 = vadd.xlane.f32.xlu2 %v1399_v14 }
 0xdce   : > { %v1401_v15 = vpop.xlane.xlu2 %1400 }
 0xdcf   : > { %1692 = vrcp.f32 %v1401_v15  ;;  %v1413_v16 = vand.u32 2147483648, %v1401_v15  ;;  %v1411_v18 = vand.u32 2147483647, %v1401_v15  ;;  %vm1407_vm7 = vweird.f32 %v1401_v15 }
 0xdd1   : > { %v1414_v39 = vor.u32 1.1754944e-38, %v1413_v16  ;;  %vm1412_vm10 = vcmp.eq.f32.partialorder %v1411_v18, 8.507059e+37 }
 0xdd5   : > { %v1693_v43 = vpop.eup %1692 }
 0xdd6   : > { %v1403_v49 = vmul.f32 %v1693_v43, %v1401_v15  ;;  %vm1408_vm8 = vweird.f32 %v1693_v43 }
 0xdd7   : > { %vm1409_vm9 = vmor %vm1407_vm7, %vm1408_vm8 }
 0xdd8   : > { %v1404_v48 = vsub.f32 1.0, %v1403_v49 }
 0xdda   : > { %v1405_v17 = vmul.f32 %v1693_v43, %v1404_v48 }
 0xddc   : > { %v1406_v19 = vadd.f32 %v1693_v43, %v1405_v17 }
 0xdde   : > { %v1410_v20 = vsel %vm1409_vm9, %v1693_v43, %v1406_v19 }
 0xddf   : > { %v1415_v21 = vsel %vm1412_vm10, %v1414_v39, %v1410_v20 }
 0xde0   : > { %v1416_v22 = vmul.f32 %v1691_v13, %v1415_v21 }
 0xde2   : > { %1417 = vst.msk [vmem:[#allocation4] sm:$0x3] %vm1392_vm6, %v1416_v22 }
 0xde3 PF: > { %p1603_p6 = scmp.eq.s32.totalorder %s1805_s28, 1  ;;  %s1753_s10 = smov [#allocation4]  }
 0xde4   : > { %s1424_s11 = sshll.u32 %s1753_s10, 4  ;;  %s1426_s16 = sshll.u32 %s2100_s8, 4  ;;  %s1425_s11 = int_to_ptr.vmem [resolvable:$true] %s1424_s11  ;;  %s1427_s16 = int_to_ptr.hbm [resolvable:$true] %s1426_s16 }
 0xde5   : > { %1600 = dma.vmem_to_hbm [thread:$0]  (%p1603_p6), %s1425_s11, 32, %s1427_s16, [#allocation5]  }
 0xde6   : > { %1727 = dma.done.wait (%p1603_p6), [#allocation5], 32  }
 0xde7   : > { %1729 = vsyncadd (%p1603_p6), [#allocation5], 4294967264 }
 0xde8 PF: > { %s19_s27 = sadd.s32 1, %s1732_s27  }
 0xde9   : > { %p16_p7 = scmp.ge.s32.totalorder %s19_s27, 4  }
 0xdeb   :  { %18 = sbr.rel (!%p16_p7) target bundleno = 1 (0x1), region = 93 }
 0xdf0   :  { %1440 = vsyncpa [#allocation5], 1 }
 0xdf1   :  { %1442 = vsyncpa [#allocation5 + $0x1], 1 }

</bundles_post_ra>
